<compile_context>
chip_gen: v6e
topology: v6e:2x2x1
jax: 0.10.0
libtpu: 0.0.40
codegen_flags: <defaults>
</compile_context>

<pallas_src>
import jax
import jax.numpy as jnp
from jax.experimental import pallas as pl
from jax.experimental.pallas import tpu as pltpu


def _round_up(a: int, b: int) -> int:
    return ((a + b - 1) // b) * b


def _pick_row_tile(M: int, *, max_tm: int = 512, num_cores: int = 2) -> int:
    """Multiple-of-8 row tile that balances work across TensorCores and
    minimizes M padding."""
    if M <= 8:
        return 8
    n_tiles = max(num_cores, -(-M // max_tm))
    tm = _round_up(-(-M // n_tiles), 8)
    return min(tm, _round_up(M, 8))


# --------------------------------------------------------------------------- #
# Kernels
# --------------------------------------------------------------------------- #
def ffn_resident_kernel(x_ref, w1_ref, b1_ref, w2_ref, b2_ref, o_ref):
    """Weights fully VMEM-resident; one grid step per row tile, full-K matmuls."""
    h = jnp.dot(x_ref[...], w1_ref[...], preferred_element_type=jnp.float32)
    h = jnp.maximum(h + b1_ref[...], 0.0)
    # Dropout is identity at inference (eval mode).
    # TODO(synk): training-mode dropout would use pltpu.prng_seed + prng_random_bits.
    o_ref[...] = (jnp.dot(h.astype(w2_ref.dtype), w2_ref[...],
                          preferred_element_type=jnp.float32)
                  + b2_ref[...]).astype(o_ref.dtype)


def ffn_tiled_kernel(x_ref, w1_ref, b1_ref, w2_ref, b2_ref, o_ref):
    """Fallback for huge d_ff: d_ff tiled on a trailing 'arbitrary' axis,
    accumulating directly into the f32 output tile (resident across j)."""
    j = pl.program_id(1)

    @pl.when(j == 0)
    def _init():
        o_ref[...] = jnp.broadcast_to(b2_ref[...], o_ref.shape).astype(o_ref.dtype)

    h = jnp.dot(x_ref[...], w1_ref[...], preferred_element_type=jnp.float32)
    h = jnp.maximum(h + b1_ref[...], 0.0)
    o_ref[...] += jnp.dot(h.astype(w2_ref.dtype), w2_ref[...],
                          preferred_element_type=jnp.float32)


# --------------------------------------------------------------------------- #
# Host-side wrappers
# --------------------------------------------------------------------------- #
def prepare_ffn_params(w1, b1, w2, b2, *, lane=128, mxu_dtype=jnp.bfloat16):
    """Pad to lane multiples + cast to the MXU dtype ONCE (cache the result).

    w1: (d_model, d_ff), b1: (d_ff,), w2: (d_ff, d_model), b2: (d_model,)
    Zero padding is exact for an FFN (padded b1=0 -> relu(0)=0; padded W2 rows=0).
    """
    d_model, d_ff = w1.shape
    d_model_pad = _round_up(d_model, lane)
    d_ff_pad = _round_up(d_ff, lane)
    w1_p = jnp.pad(w1, ((0, d_model_pad - d_model), (0, d_ff_pad - d_ff))).astype(mxu_dtype)
    w2_p = jnp.pad(w2, ((0, d_ff_pad - d_ff), (0, d_model_pad - d_model))).astype(mxu_dtype)
    b1_p = jnp.pad(b1, (0, d_ff_pad - d_ff)).reshape(1, d_ff_pad).astype(jnp.float32)
    b2_p = jnp.pad(b2, (0, d_model_pad - d_model)).reshape(1, d_model_pad).astype(jnp.float32)
    return w1_p, b1_p, w2_p, b2_p


def feed_forward(x, params, *, tm=None, tff=1024, force_tiled=False):
    """Fused FFN: relu(x @ w1 + b1) @ w2 + b2  (dropout = identity, eval mode).

    x      : (batch, seq, d_model) float32
    params : output of prepare_ffn_params (padded, bf16 weights / f32 biases)
    """
    w1_p, b1_p, w2_p, b2_p = params
    batch, seq, d_model = x.shape
    d_model_pad, d_ff_pad = w1_p.shape
    M = batch * seq

    tm = _pick_row_tile(M) if tm is None else max(8, _round_up(tm, 8))
    M_pad = _round_up(M, tm)
    n_row_tiles = M_pad // tm

    mdt = w1_p.dtype
    x_p = jnp.pad(x.reshape(M, d_model),
                  ((0, M_pad - M), (0, d_model_pad - d_model))).astype(mdt)

    w_bytes = int(w1_p.size * w1_p.dtype.itemsize + w2_p.size * w2_p.dtype.itemsize
                  + b1_p.size * 4 + b2_p.size * 4)
    io_bytes = 2 * tm * d_model_pad * (x_p.dtype.itemsize + 4)   # x + f32 out, dbl-buf
    resident_footprint = 2 * w_bytes + io_bytes + 2 * tm * d_ff_pad * 4
    resident = (not force_tiled) and resident_footprint <= (40 << 20)

    if resident:
        grid = (n_row_tiles,)
        in_specs = [
            pl.BlockSpec((tm, d_model_pad), lambda i: (i, 0)),          # x row tile
            pl.BlockSpec((d_model_pad, d_ff_pad), lambda i: (0, 0)),    # W1 (resident)
            pl.BlockSpec((1, d_ff_pad), lambda i: (0, 0)),              # b1
            pl.BlockSpec((d_ff_pad, d_model_pad), lambda i: (0, 0)),    # W2 (resident)
            pl.BlockSpec((1, d_model_pad), lambda i: (0, 0)),           # b2
        ]
        out_specs = pl.BlockSpec((tm, d_model_pad), lambda i: (i, 0))
        kernel = ffn_resident_kernel
        dims = ("parallel",)
        weight_reads = 1
        vmem_limit = resident_footprint + (4 << 20)
    else:
        # Pick a d_ff tile (multiple of 128) that divides the padded d_ff.
        tff = min(max(128, _round_up(tff, 128)), d_ff_pad)
        while d_ff_pad % tff:
            tff -= 128
        grid = (n_row_tiles, d_ff_pad // tff)
        in_specs = [
            pl.BlockSpec((tm, d_model_pad), lambda i, j: (i, 0)),       # x row tile
            pl.BlockSpec((d_model_pad, tff), lambda i, j: (0, j)),      # W1 d_ff tile
            pl.BlockSpec((1, tff), lambda i, j: (0, j)),                # b1 d_ff tile
            pl.BlockSpec((tff, d_model_pad), lambda i, j: (j, 0)),      # W2 d_ff tile
            pl.BlockSpec((1, d_model_pad), lambda i, j: (0, 0)),        # b2
        ]
        out_specs = pl.BlockSpec((tm, d_model_pad), lambda i, j: (i, 0))
        kernel = ffn_tiled_kernel
        dims = ("parallel", "arbitrary")
        weight_reads = n_row_tiles
        tile_w_bytes = 2 * d_model_pad * tff * w1_p.dtype.itemsize
        vmem_limit = (2 * (tile_w_bytes + tm * d_model_pad * (x_p.dtype.itemsize + 4))
                      + 2 * tm * tff * 4 + (4 << 20))

    vmem_limit = int(min(_round_up(vmem_limit, 1 << 20), 48 << 20))

    cost = pl.CostEstimate(
        flops=4 * M_pad * d_model_pad * d_ff_pad,          # two matmuls
        transcendentals=0,
        bytes_accessed=int(x_p.size * x_p.dtype.itemsize
                           + weight_reads * w_bytes
                           + M_pad * d_model_pad * 4),
    )

    out_flat = pl.pallas_call(
        kernel,
        out_shape=jax.ShapeDtypeStruct((M_pad, d_model_pad), jnp.float32),
        grid_spec=pltpu.PrefetchScalarGridSpec(
            num_scalar_prefetch=0,
            grid=grid,
            in_specs=in_specs,
            out_specs=out_specs,
        ),
        compiler_params=pltpu.CompilerParams(
            dimension_semantics=dims,
            vmem_limit_bytes=vmem_limit,
        ),
        cost_estimate=cost,
    )(x_p, w1_p, b1_p, w2_p, b2_p)

    return out_flat[:M, :d_model].astype(x.dtype).reshape(batch, seq, d_model)


def init_params(key, d_model, d_ff):
    """Deterministic init mimicking nn.Linear default (uniform +/- 1/sqrt(fan_in))."""
    k1, k2, k3, k4 = jax.random.split(key, 4)
    lim1 = 1.0 / jnp.sqrt(d_model)
    lim2 = 1.0 / jnp.sqrt(d_ff)
    w1 = jax.random.uniform(k1, (d_model, d_ff), jnp.float32, -lim1, lim1)
    b1 = jax.random.uniform(k2, (d_ff,), jnp.float32, -lim1, lim1)
    w2 = jax.random.uniform(k3, (d_ff, d_model), jnp.float32, -lim2, lim2)
    b2 = jax.random.uniform(k4, (d_model,), jnp.float32, -lim2, lim2)
    return w1, b1, w2, b2


if __name__ == "__main__":
    # Small, lane-dense demo shapes; the real module's d_model=300 / d_ff=2048
    # go through the same padding path (300 -> 384).
    batch, seq, d_model, d_ff = 3, 96, 256, 1024

    key = jax.random.PRNGKey(0)
    kx, kp = jax.random.split(key)
    x = jax.random.normal(kx, (batch, seq, d_model), jnp.float32)
    w1, b1, w2, b2 = init_params(kp, d_model, d_ff)

    # Pad + cast weights ONCE (cacheable across calls).
    params = prepare_ffn_params(w1, b1, w2, b2)
    params = jax.tree_util.tree_map(jax.block_until_ready, params)

    # Primary weight-resident path (weights fit VMEM).
    out = jax.block_until_ready(feed_forward(x, params))
    # Tiled-reduction fallback exercised once for correctness coverage.
    out_tiled = jax.block_until_ready(feed_forward(x, params, force_tiled=True, tff=512))

    # Pure-JAX reference with the same bf16-in / f32-accumulate recipe.
    xb = x.reshape(-1, d_model).astype(jnp.bfloat16)
    w1b, w2b = w1.astype(jnp.bfloat16), w2.astype(jnp.bfloat16)
    h = jnp.maximum(jnp.dot(xb, w1b, preferred_element_type=jnp.float32) + b1, 0.0)
    ref = jnp.dot(h.astype(jnp.bfloat16), w2b, preferred_element_type=jnp.float32) + b2
    ref = ref.reshape(batch, seq, d_model)

    assert out.shape == (batch, seq, d_model)
    assert jnp.allclose(out, ref, atol=2e-2, rtol=2e-2), "resident path mismatch"
    assert jnp.allclose(out_tiled, ref, atol=2e-2, rtol=2e-2), "tiled path mismatch"

    print("KERNEL_OK")
</pallas_src>

<mosaic_0001>
module attributes {stable_mosaic.version = 11 : i64} {
  func.func @ffn_resident_kernel(%arg0: i32, %arg1: memref<144x256xbf16, #tpu.memory_space<vmem>>, %arg2: memref<256x1024xbf16, #tpu.memory_space<vmem>>, %arg3: memref<1x1024xf32, #tpu.memory_space<vmem>>, %arg4: memref<1024x256xbf16, #tpu.memory_space<vmem>>, %arg5: memref<1x256xf32, #tpu.memory_space<vmem>>, %arg6: memref<144x256xf32, #tpu.memory_space<vmem>>) attributes {dimension_semantics = [#tpu.dimension_semantics<parallel>], iteration_bounds = array<i64: 2>, scalar_prefetch = 0 : i64, scratch_operands = 0 : i64, tpu.core_type = #tpu.core_type<tc>, window_params = [{transform_indices = @transform_0, window_bounds = array<i64: 144, 256>}, {pipeline_mode = #tpu.pipeline_mode<synchronous>, transform_indices = @transform_1, window_bounds = array<i64: 256, 1024>}, {pipeline_mode = #tpu.pipeline_mode<synchronous>, transform_indices = @transform_2, window_bounds = array<i64: 1, 1024>}, {pipeline_mode = #tpu.pipeline_mode<synchronous>, transform_indices = @transform_3, window_bounds = array<i64: 1024, 256>}, {pipeline_mode = #tpu.pipeline_mode<synchronous>, transform_indices = @transform_4, window_bounds = array<i64: 1, 256>}, {transform_indices = @transform_5, window_bounds = array<i64: 144, 256>}]} {
    %c0 = arith.constant 0 : index
    %c0_0 = arith.constant 0 : index
    %0 = vector.load %arg1[%c0, %c0_0] : memref<144x256xbf16, #tpu.memory_space<vmem>>, vector<144x256xbf16>
    %c0_1 = arith.constant 0 : index
    %c0_2 = arith.constant 0 : index
    %1 = vector.load %arg2[%c0_1, %c0_2] : memref<256x1024xbf16, #tpu.memory_space<vmem>>, vector<256x1024xbf16>
    %cst = arith.constant dense<0.000000e+00> : vector<144x1024xf32>
    %2 = tpu.matmul %0, %1, %cst {dimension_numbers = #tpu.dot_dimension_numbers<[1], [0], [0], [1], [0, 0, 1, 1], [], []>} : vector<144x256xbf16>, vector<256x1024xbf16>, vector<144x1024xf32> -> vector<144x1024xf32>
    %c0_3 = arith.constant 0 : index
    %c0_4 = arith.constant 0 : index
    %3 = vector.load %arg3[%c0_3, %c0_4] : memref<1x1024xf32, #tpu.memory_space<vmem>>, vector<1x1024xf32>
    %4 = vector.broadcast %3 : vector<1x1024xf32> to vector<144x1024xf32>
    %5 = arith.addf %2, %4 : vector<144x1024xf32>
    %cst_5 = arith.constant 0.000000e+00 : f32
    %6 = vector.broadcast %cst_5 : f32 to vector<144x1024xf32>
    %7 = arith.maximumf %5, %6 : vector<144x1024xf32>
    %8 = arith.truncf %7 : vector<144x1024xf32> to vector<144x1024xbf16>
    %c0_6 = arith.constant 0 : index
    %c0_7 = arith.constant 0 : index
    %9 = vector.load %arg4[%c0_6, %c0_7] : memref<1024x256xbf16, #tpu.memory_space<vmem>>, vector<1024x256xbf16>
    %cst_8 = arith.constant dense<0.000000e+00> : vector<144x256xf32>
    %10 = tpu.matmul %8, %9, %cst_8 {dimension_numbers = #tpu.dot_dimension_numbers<[1], [0], [0], [1], [0, 0, 1, 1], [], []>} : vector<144x1024xbf16>, vector<1024x256xbf16>, vector<144x256xf32> -> vector<144x256xf32>
    %c0_9 = arith.constant 0 : index
    %c0_10 = arith.constant 0 : index
    %11 = vector.load %arg5[%c0_9, %c0_10] : memref<1x256xf32, #tpu.memory_space<vmem>>, vector<1x256xf32>
    %12 = vector.broadcast %11 : vector<1x256xf32> to vector<144x256xf32>
    %13 = arith.addf %10, %12 : vector<144x256xf32>
    %c0_11 = arith.constant 0 : index
    %c0_12 = arith.constant 0 : index
    %14 = vector.load %arg6[%c0_11, %c0_12] : memref<144x256xf32, #tpu.memory_space<vmem>>, vector<144x256xf32>
    tpu.vector_store %arg6[%c0_11, %c0_12], %13 {strides = array<i32>} : memref<144x256xf32, #tpu.memory_space<vmem>>, vector<144x256xf32>,
    return
  }
  func.func @transform_0(%arg0: i32) -> (i32, i32) {
    %c0_i32 = arith.constant 0 : i32
    %c0_i32_0 = arith.constant 0 : i32
    return %arg0, %c0_i32 : i32, i32
  }
  func.func @transform_1(%arg0: i32) -> (i32, i32) {
    %c0_i32 = arith.constant 0 : i32
    %c0_i32_0 = arith.constant 0 : i32
    %c0_i32_1 = arith.constant 0 : i32
    return %c0_i32, %c0_i32_0 : i32, i32
  }
  func.func @transform_2(%arg0: i32) -> (i32, i32) {
    %c0_i32 = arith.constant 0 : i32
    %c0_i32_0 = arith.constant 0 : i32
    %c0_i32_1 = arith.constant 0 : i32
    return %c0_i32, %c0_i32_0 : i32, i32
  }
  func.func @transform_3(%arg0: i32) -> (i32, i32) {
    %c0_i32 = arith.constant 0 : i32
    %c0_i32_0 = arith.constant 0 : i32
    %c0_i32_1 = arith.constant 0 : i32
    return %c0_i32, %c0_i32_0 : i32, i32
  }
  func.func @transform_4(%arg0: i32) -> (i32, i32) {
    %c0_i32 = arith.constant 0 : i32
    %c0_i32_0 = arith.constant 0 : i32
    %c0_i32_1 = arith.constant 0 : i32
    return %c0_i32, %c0_i32_0 : i32, i32
  }
  func.func @transform_5(%arg0: i32) -> (i32, i32) {
    %c0_i32 = arith.constant 0 : i32
    %c0_i32_0 = arith.constant 0 : i32
    return %arg0, %c0_i32 : i32, i32
  }
}

</mosaic_0001>

<bundles_post_ra>
// kernel: tpu_custom_call.1
= control target key start
LH: loop header
LB: loop body
LE: loop exit
PB: predicated region body
PF: predicated region fallthrough
CT: control target
= control target key end

     0   :  { %10 = vsyncpa [#allocation3], 0  ;;  %s4874_s0 = inlined_call_operand.hbm [shape: bf16[288,256], index: 0, kind: input, shape index: {}]   ;;  %s4875_s1 = inlined_call_operand.hbm [shape: bf16[256,1024], index: 1, kind: input, shape index: {}]   ;;  %s4876_s2 = inlined_call_operand.hbm [shape: f32[1,1024], index: 2, kind: input, shape index: {}]   ;;  %s4877_s3 = inlined_call_operand.hbm [shape: bf16[1024,256], index: 3, kind: input, shape index: {}]   ;;  %s4878_s4 = inlined_call_operand.vmem [shape: f32[1,256], index: 4, kind: input, shape index: {}]   ;;  %s4879_s5 = inlined_call_operand.hbm [shape: f32[288,256], index: 5, kind: output, shape index: {}]  }
   0x1   :  { %12 = vsyncpa [#allocation3 + $0x1], 0 }
   0x2   :  { %13 = vsyncpa [#allocation6], 0 }
   0x3   :  { %14 = vsyncpa [#allocation9], 0 }
   0x4   :  { %15 = vsyncpa [#allocation4], 0 }
   0x5   :  { %17 = vsyncpa [#allocation4 + $0x1], 0  ;;  %s4161_s18 = smov 0   ;;  %s4163_s19 = smov 0  }
   0x6   :  { %s4165_s20 = smov 0   ;;  %s4167_s21 = smov 0  }
   0x7 LB: > { %s4182_s22 = sadd.s32 4294967295, %s4118_s21   ;;  %s3339_s23 = sadd.s32 4294967294, %s4118_s21   ;;  %s4118_s21 = sphi %s4167_s21, %s4905_s21   ;;  %s4114_s20 = sphi %s4165_s20, %s4904_s20   ;;  %s4110_s19 = sphi %s4163_s19, %s4903_s19   ;;  %s4106_s18 = sphi %s4161_s18, %s4902_s18  }
   0x8   : > { %p43_p0 = scmp.ne.s32.totalorder %s4110_s19, %s4106_s18  ;;  %p4880_p1 = scmp.eq.s32.totalorder %s4182_s22, 0 }
   0x9   : > { %p157_p3 = scmp.eq.s32.totalorder %s3339_s23, 1  ;;  %p3340_p5 = scmp.ge.s32.totalorder %s4118_s21, 1 }
   0xa   : > { %p4191_p4 = por %p4880_p1, %p43_p0  ;;  %p164_p7 = scmp.lt.s32.totalorder %s4118_s21, 3 }
   0xb   : > { %p4196_p6 = por %p157_p3, %p43_p0  ;;  %s4120_s27 = smov [#allocation5]  }
   0xc   : > { %s4885_s24 = scalar_select %p4191_p4, 1, 0 }
   0xd   : > { %s4886_s25 = scalar_select %p4196_p6, 1, 0 }
   0xe   : > { %p4201_p8 = pnand %p3340_p5, %p164_p7  ;;  %s176_s28 = sshll.u32 %s4120_s27, 4  ;;  %s177_s28 = int_to_ptr.vmem [resolvable:$true] %s176_s28 }
   0xf   : > { %s4121_s30 = smov [#allocation7]   ;;  %s4122_s7 = smov [#allocation8]  }
  0x10   : > { %s4887_s26 = scalar_select %p4201_p8, 1, 0 }
  0x11   : > { %p3654_p9 = pneg %p4201_p8  ;;  %s190_s6 = sshll.u32 %s4121_s30, 4  ;;  %s191_s6 = int_to_ptr.vmem [resolvable:$true] %s190_s6 }
  0x12   : > { %s200_s8 = sshll.u32 %s4122_s7, 4  ;;  %s3951_s9 = scalar_lea.vmem %s177_s28, 16384  ;;  %s201_s8 = int_to_ptr.vmem [resolvable:$true] %s200_s8 }
  0x13   : > { %p4210_p11 = pnand %p3654_p9, %p4880_p1  ;;  %p3952_p13 = scmp.ne.s32.totalorder %s177_s28, %s3951_s9 }
  0x14   : > { %p3959_p5 = scmp.lt.s32.totalorder %s177_s28, %s177_s28  ;;  %p3960_p7 = scmp.lt.s32.totalorder %s3951_s9, %s3951_s9 }
  0x15   : > { %p3942_p12 = pneg %p4210_p11 }
  0x16   : > { %p3961_p9 = por %p3960_p7, %p3959_p5 }
  0x17   : > { %p3954_p0 = pnand %p3952_p13, %p3942_p12 }
  0x19   : > { %p3955_p3 = pneg %p3954_p0 }
  0x1b   : > { %p3962_p10 = pnand %p3961_p9, %p3955_p3 }
  0x1d   : > { %3965 = shalt.err (!%p3962_p10)
}
  0x1e   : > { %s4123_s10 = smov 512   ;;  %s4124_s11 = smov 32  }
  0x1f   : > { %3657 = dma.hbm_to_vmem [thread:$0]  (!%p4210_p11), %s4875_s1, 16384, %s177_s28, [#allocation6], %s4123_s10, %s4123_s10, %s4124_s11  }
  0x20   : > { %s3977_s14 = scalar_lea.vmem %s191_s6, 128  ;;  %p3985_p2 = scmp.lt.s32.totalorder %s191_s6, %s191_s6 }
  0x21   : > { %p3978_p1 = scmp.ne.s32.totalorder %s191_s6, %s3977_s14  ;;  %p3986_p6 = scmp.lt.s32.totalorder %s3977_s14, %s3977_s14 }
  0x23   : > { %p3980_p13 = pnand %p3978_p1, %p3942_p12  ;;  %p3987_p5 = por %p3986_p6, %p3985_p2 }
  0x25   : > { %p3981_p0 = pneg %p3980_p13 }
  0x27   : > { %p3988_p3 = pnand %p3987_p5, %p3981_p0 }
  0x29   : > { %3991 = shalt.err (!%p3988_p3)
}
  0x2a   : > { %3660 = dma.hbm_to_vmem [thread:$0]  (!%p4210_p11), %s4876_s2, 128, %s191_s6, [#allocation6]  }
  0x2b   : > { %s4003_s17 = scalar_lea.vmem %s201_s8, 16384  ;;  %p4011_p9 = scmp.lt.s32.totalorder %s201_s8, %s201_s8 }
  0x2c   : > { %p4004_p10 = scmp.ne.s32.totalorder %s201_s8, %s4003_s17  ;;  %p4012_p13 = scmp.lt.s32.totalorder %s4003_s17, %s4003_s17 }
  0x2e   : > { %p4006_p7 = pnand %p4004_p10, %p3942_p12  ;;  %p4013_p4 = por %p4012_p13, %p4011_p9 }
  0x30   : > { %p4007_p1 = pneg %p4006_p7 }
  0x32   : > { %p4014_p2 = pnand %p4013_p4, %p4007_p1 }
  0x34   : > { %4017 = shalt.err (!%p4014_p2)
}
  0x35   : > { %s4882_s23 = smov 128   ;;  %s4126_s27 = smov 8  }
  0x36   : > { %3663 = dma.hbm_to_vmem [thread:$0]  (!%p4210_p11), %s4877_s3, 16384, %s201_s8, [#allocation9], %s4882_s23, %s4882_s23, %s4126_s27  }
  0x37   : > { %s4244_s6 = sadd.s32 1, %s4118_s21   ;;  %s30_s9 = sadd.s32 1, %s4114_s20 }
  0x38   : > { %s27_s7 = ssub.s32 %s4118_s21, %s4244_s6  ;;  %p37_p6 = scmp.ne.s32.totalorder %s4114_s20, %s4110_s19 }
  0x39   : > { %p28_p4 = scmp.eq.s32.totalorder %s27_s7, 0  ;;  %p38_p12 = scmp.eq.s32.totalorder %s4118_s21, 0 }
  0x3a   : > { %p3675_p0 = scmp.lt.s32.totalorder %s4118_s21, 2  ;;  %p4889_p3 = scmp.eq.s32.totalorder %s4182_s22, 1 }
  0x3b   : > { %s4254_s10 = scalar_select %p28_p4, %s4114_s20, %s30_s9  }
  0x3c   : > { %p39_p5 = por %p38_p12, %p37_p6  ;;  %p4258_p10 = por %p4889_p3, %p37_p6 }
  0x3d   : > { %s217_s11 = sand.u32 1, %s4114_s20   ;;  %s3633_s12 = smul.u32 2304, %s4118_s21 }
  0x3e   : > { %s4890_s29 = scalar_select %p4258_p10, 1, 0 }
  0x3f   : > { %s3635_s8 = smul.u32 144, %s217_s11  ;;  %p4264_p11 = pnand %p3675_p0, %p39_p5 }
  0x40   : > { %s4271_s16 = scalar_lea.hbm %s4874_s0, %s3633_s12  ;;  %s4275_s30 = scalar_lea.sflag [#allocation3], %s217_s11 }
  0x41   : > { %s221_s17 = scalar_lea.vmem [#allocation2], %s3635_s8  ;;  %s4018_s7 = scalar_lea.hbm %s4271_s16, 2304 }
  0x42   : > { %s229_s28 = sshll.u32 %s221_s17, 4  ;;  %p4019_p7 = scmp.ne.s32.totalorder %s4271_s16, %s4018_s7  ;;  %s4273_s28 = int_to_ptr.vmem [resolvable:$true] %s229_s28 }
  0x43   : > { %p4020_p1 = pneg %p4264_p11  ;;  %s4023_s12 = scalar_lea.hbm %s4874_s0, 4608 }
  0x44   : > { %p4024_p2 = scmp.lt.s32.totalorder %s4271_s16, %s4874_s0  ;;  %p4025_p4 = scmp.lt.s32.totalorder %s4023_s12, %s4018_s7 }
  0x45   : > { %p4021_p9 = pnand %p4020_p1, %p4019_p7 }
  0x46   : > { %p4026_p6 = por %p4025_p4, %p4024_p2 }
  0x47   : > { %p4022_p13 = pneg %p4021_p9 }
  0x49   : > { %p4027_p12 = pnand %p4026_p6, %p4022_p13 }
  0x4b   : > { %4030 = shalt.err (!%p4027_p12)
}
  0x4c   : > { %s4031_s11 = scalar_lea.vmem %s4273_s28, 2304  ;;  %s4127_s8 = smov [#allocation2]  }
  0x4d   : > { %p4032_p0 = scmp.ne.s32.totalorder %s4273_s28, %s4031_s11  ;;  %s4036_s17 = sshll.u32 %s4127_s8, 4  ;;  %s4037_s17 = int_to_ptr.vmem [resolvable:$false] %s4036_s17 }
  0x4e   : > { %s4038_s9 = scalar_lea.vmem %s4037_s17, 4608  ;;  %p4039_p7 = scmp.lt.s32.totalorder %s4273_s28, %s4037_s17 }
  0x4f   : > { %p4034_p5 = pnand %p4032_p0, %p4020_p1  ;;  %p4040_p9 = scmp.lt.s32.totalorder %s4038_s9, %s4031_s11 }
  0x51   : > { %p4035_p3 = pneg %p4034_p5  ;;  %p4041_p10 = por %p4040_p9, %p4039_p7 }
  0x53   : > { %p4042_p8 = pnand %p4041_p10, %p4035_p3 }
  0x55   : > { %4045 = shalt.err (!%p4042_p8)
}
  0x56   : > { %s4892_s23 = smov 128   ;;  %p4893_p1 = scmp.ne.s32.totalorder %s4887_s26, 0 }
  0x57   : > { %3667 = dma.hbm_to_vmem [thread:$0]  (!%p4264_p11), %s4271_s16, 2304, %s4273_s28, %s4275_s30, %s4892_s23, %s4892_s23, %s4126_s27  }
  0x58   : > { %241 = sbr.rel (%p4893_p1) target bundleno = 727 (0x2d7), region = 40  ;;  %s4302_s7 = sand.u32 (!%p4893_p1), 1, %s4110_s19  }
  0x59   : > { %s3636_s14 = smul.u32 (!%p4893_p1), 144, %s4302_s7  ;;  %s244_s12 = scalar_lea.sflag (!%p4893_p1), [#allocation3], %s4302_s7 }
  0x5a   : > { %p4894_p8 = scmp.ne.s32.totalorder (!%p4893_p1), %s4885_s24, 0 }
  0x5b   : > { %s4306_s15 = scalar_lea.vmem (!%p4893_p1), [#allocation2], %s3636_s14 }
  0x5d   : > { %4089 = dma.done.wait (%p4894_p8), %s244_s12, 2304  }
  0x5e   : > { %4091 = vsyncadd (%p4894_p8), %s244_s12, 4294964992  ;;  %p4895_p10 = scmp.eq.s32.totalorder %s4182_s22, 0 }
  0x60   : > { %4093 = dma.done.wait (%p4895_p10), [#allocation6], 16512   ;;  %p4896_p11 = pmov %p4895_p10 }
  0x61   : > { %p4897_p13 = pmov %p4895_p10 }
  0x62   : > { %4095 = vsyncadd (%p4896_p11), [#allocation6], 4294950784 }
  0x63   : > { %4097 = dma.done.wait (%p4897_p13), [#allocation9], 16384   ;;  %p4898_p2 = pmov %p4895_p10 }
  0x64   : > { %v362_v0 = vld [vmem:[#allocation5 + $0x1c0] sm:$0xff]  ;;  %v363_v2 = vld [vmem:[#allocation5 + $0x1c8] sm:$0xff]  ;;  %s3637_s27 = smul.u32 288, %s4302_s7  ;;  %p4899_p6 = scmp.ne.s32.totalorder %s4890_s29, 0 }
  0x65   : > { %4099 = vsyncadd (%p4898_p2), [#allocation9], 4294950912  ;;  %v366_v1 = vld [vmem:[#allocation5 + $0x1e0] sm:$0xff]  ;;  %v367_v4 = vld [vmem:[#allocation5 + $0x1e8] sm:$0xff]  ;;  %s3634_s16 = smul.u32 4608, %s4182_s22  ;;  %s3223_s22 = scalar_lea.sflag [#allocation4], %s4302_s7 }
  0x66   : > { %v3426_v3 = vcombine.high %v362_v0, %v366_v1  ;;  %v3425_v5 = vcombine.low %v362_v0, %v366_v1  ;;  %v354_v6 = vld [vmem:[#allocation5 + $0x180] sm:$0xff]  ;;  %v3428_v8 = vcombine.high %v363_v2, %v367_v4  ;;  %v3427_v9 = vcombine.low %v363_v2, %v367_v4  ;;  %v355_v11 = vld [vmem:[#allocation5 + $0x188] sm:$0xff]  ;;  %s4752_s13 = scalar_lea.vmem [#allocation10], %s3637_s27  ;;  %s4128_s9 = smov [#allocation10]  }
  0x67   : > { %v358_v7 = vld [vmem:[#allocation5 + $0x1a0] sm:$0xff]  ;;  %v359_v12 = vld [vmem:[#allocation5 + $0x1a8] sm:$0xff]  ;;  %s3237_s28 = sshll.u32 %s4752_s13, 4  ;;  %s4827_s8 = scalar_lea.hbm %s4879_s5, %s3634_s16  ;;  %s4829_s28 = int_to_ptr.vmem [resolvable:$true] %s3237_s28 }
  0x68   : > { %v3418_v10 = vcombine.high %v354_v6, %v358_v7  ;;  %v346_v13 = vld [vmem:[#allocation5 + $0x140] sm:$0xff]  ;;  %1206 = vmatprep.subr.bf16.mxu0 %v3426_v3  ;;  %v3420_v14 = vcombine.high %v355_v11, %v359_v12  ;;  %v347_v16 = vld [vmem:[#allocation5 + $0x148] sm:$0xff]  ;;  %1329 = vmatprep.subr.bf16.mxu1 %v3428_v8  ;;  %v3417_v18 = vcombine.low %v354_v6, %v358_v7  ;;  %s4046_s17 = scalar_lea.vmem %s4829_s28, 4608  ;;  %s4050_s23 = sshll.u32 %s4128_s9, 4  ;;  %s4051_s23 = int_to_ptr.vmem [resolvable:$false] %s4050_s23 }
  0x69   : > { %v350_v15 = vld [vmem:[#allocation5 + $0x160] sm:$0xff]  ;;  %v351_v17 = vld [vmem:[#allocation5 + $0x168] sm:$0xff]  ;;  %1207 = vmatpush1.bf16.msra.mxu0 %v3425_v5  ;;  %1330 = vmatpush1.bf16.msra.mxu1 %v3427_v9  ;;  %v3419_v19 = vcombine.low %v355_v11, %v359_v12  ;;  %p4047_p4 = scmp.ne.s32.totalorder %s4829_s28, %s4046_s17  ;;  %s4052_s14 = scalar_lea.vmem %s4051_s23, 9216 }
  0x6a   : > { %1208 = vmatprep.subr.bf16.mxu0 %v3418_v10  ;;  %v3410_v20 = vcombine.high %v346_v13, %v350_v15  ;;  %1331 = vmatprep.subr.bf16.mxu1 %v3420_v14  ;;  %v3412_v21 = vcombine.high %v347_v16, %v351_v17  ;;  %v338_v22 = vld [vmem:[#allocation5 + $0x100] sm:$0xff]  ;;  %v339_v24 = vld [vmem:[#allocation5 + $0x108] sm:$0xff]  ;;  %v3409_v26 = vcombine.low %v346_v13, %v350_v15  ;;  %p4053_p5 = scmp.lt.s32.totalorder %s4829_s28, %s4051_s23  ;;  %p4054_p3 = scmp.lt.s32.totalorder %s4052_s14, %s4046_s17 }
  0x6b   : > { %v342_v23 = vld [vmem:[#allocation5 + $0x120] sm:$0xff]  ;;  %v343_v25 = vld [vmem:[#allocation5 + $0x128] sm:$0xff]  ;;  %v3411_v27 = vcombine.low %v347_v16, %v351_v17  ;;  %p4048_p12 = pnand %p4047_p4, %p4899_p6 }
  0x6c   : > { %v3402_v28 = vcombine.high %v338_v22, %v342_v23  ;;  %v3404_v29 = vcombine.high %v339_v24, %v343_v25  ;;  %v330_v30 = vld [vmem:[#allocation5 + $0xc0] sm:$0xff]  ;;  %v331_v32 = vld [vmem:[#allocation5 + $0xc8] sm:$0xff]  ;;  %v3401_v34 = vcombine.low %v338_v22, %v342_v23  ;;  %v3403_v35 = vcombine.low %v339_v24, %v343_v25  ;;  %p4055_p7 = por %p4054_p3, %p4053_p5 }
  0x6d   : > { %1209 = vmatpush1.bf16.msra.mxu0 %v3417_v18  ;;  %1332 = vmatpush1.bf16.msra.mxu1 %v3419_v19  ;;  %v334_v31 = vld [vmem:[#allocation5 + $0xe0] sm:$0xff]  ;;  %v335_v33 = vld [vmem:[#allocation5 + $0xe8] sm:$0xff]  ;;  %p4049_p0 = pneg %p4048_p12 }
  0x6e   : > { %1210 = vmatprep.subr.bf16.mxu0 %v3410_v20  ;;  %1333 = vmatprep.subr.bf16.mxu1 %v3412_v21  ;;  %v3394_v36 = vcombine.high %v330_v30, %v334_v31  ;;  %v3396_v37 = vcombine.high %v331_v32, %v335_v33  ;;  %v322_v38 = vld [vmem:[#allocation5 + $0x80] sm:$0xff]  ;;  %v323_v40 = vld [vmem:[#allocation5 + $0x88] sm:$0xff]  ;;  %v3393_v42 = vcombine.low %v330_v30, %v334_v31 }
  0x6f   : > { %v326_v39 = vld [vmem:[#allocation5 + $0xa0] sm:$0xff]  ;;  %v327_v41 = vld [vmem:[#allocation5 + $0xa8] sm:$0xff]  ;;  %v3395_v43 = vcombine.low %v331_v32, %v335_v33  ;;  %p4056_p9 = pnand %p4055_p7, %p4049_p0 }
  0x70   : > { %v3386_v44 = vcombine.high %v322_v38, %v326_v39  ;;  %v3388_v45 = vcombine.high %v323_v40, %v327_v41  ;;  %v314_v46 = vld [vmem:[#allocation5 + $0x40] sm:$0xff]  ;;  %v315_v48 = vld [vmem:[#allocation5 + $0x48] sm:$0xff]  ;;  %v3385_v50 = vcombine.low %v322_v38, %v326_v39  ;;  %v3387_v51 = vcombine.low %v323_v40, %v327_v41 }
  0x71   : > { %1211 = vmatpush1.bf16.msra.mxu0 %v3409_v26  ;;  %1334 = vmatpush1.bf16.msra.mxu1 %v3411_v27  ;;  %v318_v47 = vld [vmem:[#allocation5 + $0x60] sm:$0xff]  ;;  %v319_v49 = vld [vmem:[#allocation5 + $0x68] sm:$0xff] }
  0x72   : > { %1212 = vmatprep.subr.bf16.mxu0 %v3402_v28  ;;  %1335 = vmatprep.subr.bf16.mxu1 %v3404_v29  ;;  %v3378_v52 = vcombine.high %v314_v46, %v318_v47  ;;  %v3380_v53 = vcombine.high %v315_v48, %v319_v49  ;;  %v306_v54 = vld [vmem:[#allocation5] sm:$0xff]  ;;  %v307_v57 = vld [vmem:[#allocation5 + $0x8] sm:$0xff]  ;;  %v3377_v59 = vcombine.low %v314_v46, %v318_v47 }
  0x73   : > { %v310_v55 = vld [vmem:[#allocation5 + $0x20] sm:$0xff]  ;;  %v311_v58 = vld [vmem:[#allocation5 + $0x28] sm:$0xff]  ;;  %v3379_v60 = vcombine.low %v315_v48, %v319_v49 }
  0x74   : > { %v4321_v56 = vld [vmem:[%s4306_s15 + $0x4] ss:$8 sps:$4 sm:$0xff]   ;;  %v3370_v61 = vcombine.high %v306_v54, %v310_v55  ;;  %v3372_v62 = vcombine.high %v307_v57, %v311_v58  ;;  %v3369_v3 = vcombine.low %v306_v54, %v310_v55  ;;  %v3371_v4 = vcombine.low %v307_v57, %v311_v58 }
  0x75   : > { %1213 = vmatpush1.bf16.msra.mxu0 %v3401_v34  ;;  %1336 = vmatpush1.bf16.msra.mxu1 %v3403_v35  ;;  %v426_v63 = vld [vmem:[#allocation5 + $0x3c0] sm:$0xff]  ;;  %v427_v1 = vld [vmem:[#allocation5 + $0x3c8] sm:$0xff] }
  0x76   : > { %1214 = vmatprep.subr.bf16.mxu0 %v3394_v36  ;;  %1337 = vmatprep.subr.bf16.mxu1 %v3396_v37  ;;  %v430_v0 = vld [vmem:[#allocation5 + $0x3e0] sm:$0xff]  ;;  %v431_v2 = vld [vmem:[#allocation5 + $0x3e8] sm:$0xff] }
  0x77   : > { %1238 = vmatprep.mubr.bf16.mxu0 %v4321_v56  ;;  %1361 = vmatprep.mubr.bf16.mxu1 %v4321_v56  ;;  %v3490_v5 = vcombine.high %v426_v63, %v430_v0  ;;  %v3492_v6 = vcombine.high %v427_v1, %v431_v2  ;;  %v418_v7 = vld [vmem:[#allocation5 + $0x380] sm:$0xff]  ;;  %v419_v9 = vld [vmem:[#allocation5 + $0x388] sm:$0xff]  ;;  %v3489_v11 = vcombine.low %v426_v63, %v430_v0 }
  0x78   : > { %v422_v8 = vld [vmem:[#allocation5 + $0x3a0] sm:$0xff]  ;;  %v423_v10 = vld [vmem:[#allocation5 + $0x3a8] sm:$0xff]  ;;  %v3491_v12 = vcombine.low %v427_v1, %v431_v2  ;;  %v365_v1 = vld [vmem:[#allocation5 + $0x1d8] sm:$0xff] }
  0x79   : > { %1215 = vmatpush1.bf16.msra.mxu0 %v3393_v42  ;;  %1338 = vmatpush1.bf16.msra.mxu1 %v3395_v43  ;;  %v3482_v13 = vcombine.high %v418_v7, %v422_v8  ;;  %v3484_v14 = vcombine.high %v419_v9, %v423_v10  ;;  %v410_v15 = vld [vmem:[#allocation5 + $0x340] sm:$0xff]  ;;  %v411_v17 = vld [vmem:[#allocation5 + $0x348] sm:$0xff]  ;;  %v3481_v19 = vcombine.low %v418_v7, %v422_v8  ;;  %v369_v2 = vld [vmem:[#allocation5 + $0x1f8] sm:$0xff] }
  0x7a   : > { %1216 = vmatprep.subr.bf16.mxu0 %v3386_v44  ;;  %1339 = vmatprep.subr.bf16.mxu1 %v3388_v45  ;;  %v414_v16 = vld [vmem:[#allocation5 + $0x360] sm:$0xff]  ;;  %v415_v18 = vld [vmem:[#allocation5 + $0x368] sm:$0xff]  ;;  %v3483_v20 = vcombine.low %v419_v9, %v423_v10  ;;  %v3432_v10 = vcombine.high %v365_v1, %v369_v2 }
  0x7b   : > { %v3474_v21 = vcombine.high %v410_v15, %v414_v16  ;;  %v3476_v22 = vcombine.high %v411_v17, %v415_v18  ;;  %v402_v23 = vld [vmem:[#allocation5 + $0x300] sm:$0xff]  ;;  %v403_v25 = vld [vmem:[#allocation5 + $0x308] sm:$0xff]  ;;  %v3473_v27 = vcombine.low %v410_v15, %v414_v16  ;;  %v3475_v28 = vcombine.low %v411_v17, %v415_v18  ;;  %v348_v15 = vld [vmem:[#allocation5 + $0x150] sm:$0xff] }
  0x7c   : > { %v406_v24 = vld [vmem:[#allocation5 + $0x320] sm:$0xff]  ;;  %v407_v26 = vld [vmem:[#allocation5 + $0x328] sm:$0xff]  ;;  %v352_v16 = vld [vmem:[#allocation5 + $0x170] sm:$0xff]  ;;  %v3431_v17 = vcombine.low %v365_v1, %v369_v2 }
  0x7d   : > { %1217 = vmatpush1.bf16.msra.mxu0 %v3385_v50  ;;  %1340 = vmatpush1.bf16.msra.mxu1 %v3387_v51  ;;  %v3466_v29 = vcombine.high %v402_v23, %v406_v24  ;;  %v3468_v30 = vcombine.high %v403_v25, %v407_v26  ;;  %v394_v31 = vld [vmem:[#allocation5 + $0x2c0] sm:$0xff]  ;;  %v395_v33 = vld [vmem:[#allocation5 + $0x2c8] sm:$0xff]  ;;  %v3465_v35 = vcombine.low %v402_v23, %v406_v24  ;;  %v340_v23 = vld [vmem:[#allocation5 + $0x110] sm:$0xff] }
  0x7e   : > { %1218 = vmatprep.subr.bf16.mxu0 %v3378_v52  ;;  %1341 = vmatprep.subr.bf16.mxu1 %v3380_v53  ;;  %v398_v32 = vld [vmem:[#allocation5 + $0x2e0] sm:$0xff]  ;;  %v399_v34 = vld [vmem:[#allocation5 + $0x2e8] sm:$0xff]  ;;  %v3467_v36 = vcombine.low %v403_v25, %v407_v26  ;;  %v344_v24 = vld [vmem:[#allocation5 + $0x130] sm:$0xff] }
  0x7f   : > { %v3458_v37 = vcombine.high %v394_v31, %v398_v32  ;;  %v3460_v38 = vcombine.high %v395_v33, %v399_v34  ;;  %v386_v39 = vld [vmem:[#allocation5 + $0x280] sm:$0xff]  ;;  %v387_v41 = vld [vmem:[#allocation5 + $0x288] sm:$0xff]  ;;  %v3457_v43 = vcombine.low %v394_v31, %v398_v32  ;;  %v3459_v44 = vcombine.low %v395_v33, %v399_v34  ;;  %v332_v33 = vld [vmem:[#allocation5 + $0xd0] sm:$0xff] }
  0x80   : > { %v390_v40 = vld [vmem:[#allocation5 + $0x2a0] sm:$0xff]  ;;  %v391_v42 = vld [vmem:[#allocation5 + $0x2a8] sm:$0xff]  ;;  %v3413_v31 = vcombine.low %v348_v15, %v352_v16  ;;  %v336_v34 = vld [vmem:[#allocation5 + $0xf0] sm:$0xff] }
  0x81   : > { %1219 = vmatpush1.bf16.msra.mxu0 %v3377_v59  ;;  %1342 = vmatpush1.bf16.msra.mxu1 %v3379_v60  ;;  %v3450_v45 = vcombine.high %v386_v39, %v390_v40  ;;  %v3452_v46 = vcombine.high %v387_v41, %v391_v42  ;;  %v378_v47 = vld [vmem:[#allocation5 + $0x240] sm:$0xff]  ;;  %v379_v49 = vld [vmem:[#allocation5 + $0x248] sm:$0xff]  ;;  %v3449_v51 = vcombine.low %v386_v39, %v390_v40  ;;  %v312_v1 = vld [vmem:[#allocation5 + $0x30] sm:$0xff] }
  0x82   : > { %1220 = vmatprep.subr.bf16.mxu0 %v3370_v61  ;;  %1343 = vmatprep.subr.bf16.mxu1 %v3372_v62  ;;  %v382_v48 = vld [vmem:[#allocation5 + $0x260] sm:$0xff]  ;;  %v383_v50 = vld [vmem:[#allocation5 + $0x268] sm:$0xff]  ;;  %v3451_v52 = vcombine.low %v387_v41, %v391_v42  ;;  %v364_v61 = vld [vmem:[#allocation5 + $0x1d0] sm:$0xff]  ;;  %v3405_v40 = vcombine.low %v340_v23, %v344_v24  ;;  %v3398_v42 = vcombine.high %v332_v33, %v336_v34 }
  0x83   : > { %v3442_v53 = vcombine.high %v378_v47, %v382_v48  ;;  %v370_v54 = vld [vmem:[#allocation5 + $0x200] sm:$0xff]  ;;  %v3444_v57 = vcombine.high %v379_v49, %v383_v50  ;;  %v371_v58 = vld [vmem:[#allocation5 + $0x208] sm:$0xff]  ;;  %v3441_v60 = vcombine.low %v378_v47, %v382_v48  ;;  %v368_v62 = vld [vmem:[#allocation5 + $0x1f0] sm:$0xff]  ;;  %v3443_v63 = vcombine.low %v379_v49, %v383_v50 }
  0x84   : > { %v374_v55 = vld [vmem:[#allocation5 + $0x220] sm:$0xff]  ;;  %v375_v59 = vld [vmem:[#allocation5 + $0x228] sm:$0xff]  ;;  %v3430_v9 = vcombine.high %v364_v61, %v368_v62  ;;  %v3397_v47 = vcombine.low %v332_v33, %v336_v34  ;;  %v325_v48 = vld [vmem:[#allocation5 + $0x98] sm:$0xff] }
  0x85   : > { %1221 = vmatpush1.bf16.msra.mxu0 %v3369_v3  ;;  %1344 = vmatpush1.bf16.msra.mxu1 %v3371_v4  ;;  %v3434_v0 = vcombine.high %v370_v54, %v374_v55  ;;  %v3436_v3 = vcombine.high %v371_v58, %v375_v59  ;;  %v3433_v4 = vcombine.low %v370_v54, %v374_v55  ;;  %v4326_v8 = vld [vmem:[%s4306_s15] ss:$8 sps:$4 sm:$0xff]   ;;  %v4334_v26 = vld [vmem:[%s4306_s15 + $0x10] ss:$8 sps:$4 sm:$0xff]   ;;  %v4339_v32 = vld [vmem:[%s4306_s15 + $0x24] ss:$8 sps:$4 sm:$0xff]  }
  0x86   : > { %1222 = vmatprep.subr.bf16.mxu0 %v3490_v5  ;;  %1345 = vmatprep.subr.bf16.mxu1 %v3492_v6  ;;  %v356_v5 = vld [vmem:[#allocation5 + $0x190] sm:$0xff]  ;;  %v3435_v7 = vcombine.low %v371_v58, %v375_v59  ;;  %v329_v49 = vld [vmem:[#allocation5 + $0xb8] sm:$0xff] }
  0x87   : > { %v360_v6 = vld [vmem:[#allocation5 + $0x1b0] sm:$0xff]  ;;  %v3392_v55 = vcombine.high %v325_v48, %v329_v49  ;;  %v321_v58 = vld [vmem:[#allocation5 + $0x78] sm:$0xff] }
  0x88   : > { %v3422_v18 = vcombine.high %v356_v5, %v360_v6  ;;  %v320_v54 = vld [vmem:[#allocation5 + $0x70] sm:$0xff]  ;;  %v417_v33 = vld [vmem:[#allocation5 + $0x378] sm:$0xff] }
  0x89   : > { %1223 = vmatpush2.bf16.msra.mxu0 %v3489_v11  ;;  %1346 = vmatpush2.bf16.msra.mxu1 %v3491_v12  ;;  %v357_v11 = vld [vmem:[#allocation5 + $0x198] sm:$0xff] }
  0x8a   : > { %1224 = vmatprep.subr.bf16.mxu0 %v3482_v13  ;;  %1347 = vmatprep.subr.bf16.mxu1 %v3484_v14  ;;  %v361_v12 = vld [vmem:[#allocation5 + $0x1b8] sm:$0xff]  ;;  %v3429_v13 = vcombine.low %v364_v61, %v368_v62 }
  0x8b   : > { %v4329_v14 = vld [vmem:[%s4306_s15 + $0x14] ss:$8 sps:$4 sm:$0xff]   ;;  %v3423_v25 = vcombine.low %v357_v11, %v361_v12 }
  0x8d   : > { %1225 = vmatpush2.bf16.msra.mxu0 %v3481_v19  ;;  %1348 = vmatpush2.bf16.msra.mxu1 %v3483_v20  ;;  %v349_v19 = vld [vmem:[#allocation5 + $0x158] sm:$0xff] }
  0x8e   : > { %1226 = vmatprep.subr.bf16.mxu0 %v3474_v21  ;;  %1349 = vmatprep.subr.bf16.mxu1 %v3476_v22  ;;  %v353_v20 = vld [vmem:[#allocation5 + $0x178] sm:$0xff]  ;;  %v3424_v21 = vcombine.high %v357_v11, %v361_v12  ;;  %v3421_v22 = vcombine.low %v356_v5, %v360_v6 }
  0x8f   : > { %v4359_v6 = vld [vmem:[%s4306_s15 + $0x44] ss:$8 sps:$4 sm:$0xff]  }
  0x90   : > { %v429_v12 = vld [vmem:[#allocation5 + $0x3d8] sm:$0xff] }
  0x91   : > { %1227 = vmatpush2.bf16.msra.mxu0 %v3473_v27  ;;  %1350 = vmatpush2.bf16.msra.mxu1 %v3475_v28  ;;  %v3414_v27 = vcombine.high %v348_v15, %v352_v16  ;;  %v3416_v28 = vcombine.high %v349_v19, %v353_v20  ;;  %v4365_v16 = vld [vmem:[%s4306_s15 + $0x40] ss:$8 sps:$4 sm:$0xff]  }
  0x92   : > { %1228 = vmatprep.subr.bf16.mxu0 %v3466_v29  ;;  %1351 = vmatprep.subr.bf16.mxu1 %v3468_v30  ;;  %v341_v29 = vld [vmem:[#allocation5 + $0x118] sm:$0xff] }
  0x93   : > { %v345_v30 = vld [vmem:[#allocation5 + $0x138] sm:$0xff] }
  0x94   : > { %v3408_v39 = vcombine.high %v341_v29, %v345_v30  ;;  %v3407_v41 = vcombine.low %v341_v29, %v345_v30 }
  0x95   : > { %1229 = vmatpush2.bf16.msra.mxu0 %v3465_v35  ;;  %1352 = vmatpush2.bf16.msra.mxu1 %v3467_v36  ;;  %v3415_v35 = vcombine.low %v349_v19, %v353_v20  ;;  %v3406_v36 = vcombine.high %v340_v23, %v344_v24  ;;  %v420_v19 = vld [vmem:[#allocation5 + $0x390] sm:$0xff]  ;;  %v425_v23 = vld [vmem:[#allocation5 + $0x3b8] sm:$0xff] }
  0x96   : > { %1230 = vmatprep.subr.bf16.mxu0 %v3458_v37  ;;  %1353 = vmatprep.subr.bf16.mxu1 %v3460_v38  ;;  %v333_v37 = vld [vmem:[#allocation5 + $0xd8] sm:$0xff]  ;;  %v424_v20 = vld [vmem:[#allocation5 + $0x3b0] sm:$0xff] }
  0x97   : > { %v337_v38 = vld [vmem:[#allocation5 + $0xf8] sm:$0xff]  ;;  %v3486_v30 = vcombine.high %v420_v19, %v424_v20 }
  0x98   : > { %v3399_v50 = vcombine.low %v333_v37, %v337_v38  ;;  %v4369_v24 = vld [vmem:[%s4306_s15 + $0x54] ss:$8 sps:$4 sm:$0xff]  }
  0x99   : > { %1231 = vmatpush2.bf16.msra.mxu0 %v3457_v43  ;;  %1354 = vmatpush2.bf16.msra.mxu1 %v3459_v44  ;;  %v3400_v43 = vcombine.high %v333_v37, %v337_v38  ;;  %v4346_v44 = vld [vmem:[%s4306_s15 + $0x20] ss:$8 sps:$4 sm:$0xff]  }
  0x9a   : > { %1232 = vmatprep.subr.bf16.mxu0 %v3450_v45  ;;  %1355 = vmatprep.subr.bf16.mxu1 %v3452_v46  ;;  %v324_v45 = vld [vmem:[#allocation5 + $0x90] sm:$0xff] }
  0x9b   : > { %v328_v46 = vld [vmem:[#allocation5 + $0xb0] sm:$0xff] }
  0x9c   : > { %v3389_v59 = vcombine.low %v324_v45, %v328_v46  ;;  %v404_v38 = vld [vmem:[#allocation5 + $0x310] sm:$0xff] }
  0x9d   : > { %1233 = vmatpush2.bf16.msra.mxu0 %v3449_v51  ;;  %1356 = vmatpush2.bf16.msra.mxu1 %v3451_v52  ;;  %v4349_v51 = vld [vmem:[%s4306_s15 + $0x34] ss:$8 sps:$4 sm:$0xff]   ;;  %v3390_v52 = vcombine.high %v324_v45, %v328_v46 }
  0x9e   : > { %1234 = vmatprep.subr.bf16.mxu0 %v3442_v53  ;;  %1357 = vmatprep.subr.bf16.mxu1 %v3444_v57  ;;  %v316_v53 = vld [vmem:[#allocation5 + $0x50] sm:$0xff]  ;;  %v317_v57 = vld [vmem:[#allocation5 + $0x58] sm:$0xff] }
  0x9f   : > { %v3382_v61 = vcombine.high %v316_v53, %v320_v54  ;;  %v3384_v62 = vcombine.high %v317_v57, %v321_v58  ;;  %v3381_v2 = vcombine.low %v316_v53, %v320_v54  ;;  %v3383_v5 = vcombine.low %v317_v57, %v321_v58  ;;  %v401_v53 = vld [vmem:[#allocation5 + $0x2f8] sm:$0xff] }
  0xa0   : > { %v4386_v57 = vld [vmem:[%s4306_s15 + $0x60] ss:$8 sps:$4 sm:$0xff]  }
  0xa1   : > { %1235 = vmatpush2.bf16.msra.mxu0 %v3441_v60  ;;  %1358 = vmatpush2.bf16.msra.mxu1 %v3443_v63  ;;  %v3391_v60 = vcombine.low %v325_v48, %v329_v49  ;;  %v4356_v63 = vld [vmem:[%s4306_s15 + $0x30] ss:$8 sps:$4 sm:$0xff]  }
  0xa2   : > { %1236 = vmatprep.subr.bf16.mxu0 %v3434_v0  ;;  %1359 = vmatprep.subr.bf16.mxu1 %v3436_v3  ;;  %v308_v0 = vld [vmem:[#allocation5 + $0x10] sm:$0xff]  ;;  %v309_v3 = vld [vmem:[#allocation5 + $0x18] sm:$0xff] }
  0xa3   : > { %v3373_v15 = vcombine.low %v308_v0, %v312_v1  ;;  %v400_v48 = vld [vmem:[#allocation5 + $0x2f0] sm:$0xff] }
  0xa5   : > { %1237 = vmatpush2.bf16.msra.mxu0 %v3433_v4  ;;  %1360 = vmatpush2.bf16.msra.mxu1 %v3435_v7  ;;  %v313_v4 = vld [vmem:[#allocation5 + $0x38] sm:$0xff]  ;;  %v3374_v7 = vcombine.high %v308_v0, %v312_v1 }
  0xa6   : > { %1452 = vmatprep.subr.bf16.mxu0 %v3430_v9  ;;  %1575 = vmatprep.subr.bf16.mxu1 %v3432_v10  ;;  %v428_v9 = vld [vmem:[#allocation5 + $0x3d0] sm:$0xff]  ;;  %v3376_v11 = vcombine.high %v309_v3, %v313_v4  ;;  %v389_v0 = vld [vmem:[#allocation5 + $0x298] sm:$0xff] }
  0xa7   : > { %v432_v10 = vld [vmem:[#allocation5 + $0x3f0] sm:$0xff]  ;;  %v393_v1 = vld [vmem:[#allocation5 + $0x2b8] sm:$0xff] }
  0xa8   : > { %1239 = vmatmul.mubr.bf16.vlgmr.msra.gmra.mxu0 %v4326_v8  ;;  %1362 = vmatmul.mubr.bf16.vlgmr.msra.gmra.mxu1 %v4326_v8 }
  0xa9   : > { %1453 = vmatpush1.bf16.msra.mxu0 %v3429_v13  ;;  %1576 = vmatpush1.bf16.msra.mxu1 %v3431_v17  ;;  %v433_v13 = vld [vmem:[#allocation5 + $0x3f8] sm:$0xff]  ;;  %v3375_v17 = vcombine.low %v309_v3, %v313_v4 }
  0xaa   : > { %1454 = vmatprep.subr.bf16.mxu0 %v3422_v18  ;;  %1248 = vmatprep.mubr.bf16.mxu0 %v4329_v14  ;;  %v3494_v18 = vcombine.high %v428_v9, %v432_v10  ;;  %v3495_v29 = vcombine.low %v429_v12, %v433_v13 }
  0xab   : > { %1371 = vmatprep.mubr.bf16.mxu1 %v4329_v14  ;;  %1577 = vmatprep.subr.bf16.mxu1 %v3424_v21  ;;  %v3496_v21 = vcombine.high %v429_v12, %v433_v13  ;;  %v385_v12 = vld [vmem:[#allocation5 + $0x278] sm:$0xff] }
  0xad   : > { %1455 = vmatpush1.bf16.msra.mxu0 %v3421_v22  ;;  %1578 = vmatpush1.bf16.msra.mxu1 %v3423_v25  ;;  %v421_v22 = vld [vmem:[#allocation5 + $0x398] sm:$0xff]  ;;  %v3493_v25 = vcombine.low %v428_v9, %v432_v10  ;;  %v380_v9 = vld [vmem:[#allocation5 + $0x250] sm:$0xff] }
  0xae   : > { %1456 = vmatprep.subr.bf16.mxu0 %v3414_v27  ;;  %1579 = vmatprep.subr.bf16.mxu1 %v3416_v28  ;;  %v412_v27 = vld [vmem:[#allocation5 + $0x350] sm:$0xff]  ;;  %v3488_v34 = vcombine.high %v421_v22, %v425_v23 }
  0xaf   : > { %v416_v28 = vld [vmem:[#allocation5 + $0x370] sm:$0xff] }
  0xb0   : > { %1249 = vmatmul.mubr.bf16.gmra.mxu0 %v4334_v26  ;;  %1372 = vmatmul.mubr.bf16.gmra.mxu1 %v4334_v26  ;;  %v3478_v37 = vcombine.high %v412_v27, %v416_v28  ;;  %v3477_v46 = vcombine.low %v412_v27, %v416_v28  ;;  %v384_v10 = vld [vmem:[#allocation5 + $0x270] sm:$0xff] }
  0xb1   : > { %1457 = vmatpush1.bf16.msra.mxu0 %v3413_v31  ;;  %1580 = vmatpush1.bf16.msra.mxu1 %v3415_v35  ;;  %v413_v31 = vld [vmem:[#allocation5 + $0x358] sm:$0xff]  ;;  %v3485_v35 = vcombine.low %v420_v19, %v424_v20  ;;  %v372_v20 = vld [vmem:[#allocation5 + $0x210] sm:$0xff]  ;;  %v3445_v27 = vcombine.low %v380_v9, %v384_v10 }
  0xb2   : > { %1458 = vmatprep.subr.bf16.mxu0 %v3406_v36  ;;  %1258 = vmatprep.mubr.bf16.mxu0 %v4339_v32  ;;  %v4376_v36 = vld [vmem:[%s4306_s15 + $0x50] ss:$8 sps:$4 sm:$0xff]   ;;  %v3480_v45 = vcombine.high %v413_v31, %v417_v33  ;;  %v3479_v49 = vcombine.low %v413_v31, %v417_v33 }
  0xb3   : > { %1381 = vmatprep.mubr.bf16.mxu1 %v4339_v32  ;;  %1581 = vmatprep.subr.bf16.mxu1 %v3408_v39  ;;  %v408_v39 = vld [vmem:[#allocation5 + $0x330] sm:$0xff] }
  0xb5   : > { %1459 = vmatpush1.bf16.msra.mxu0 %v3405_v40  ;;  %1582 = vmatpush1.bf16.msra.mxu1 %v3407_v41  ;;  %v3487_v40 = vcombine.low %v421_v22, %v425_v23  ;;  %v405_v41 = vld [vmem:[#allocation5 + $0x318] sm:$0xff] }
  0xb6   : > { %1460 = vmatprep.subr.bf16.mxu0 %v3398_v42  ;;  %1583 = vmatprep.subr.bf16.mxu1 %v3400_v43  ;;  %v409_v42 = vld [vmem:[#allocation5 + $0x338] sm:$0xff] }
  0xb7   : > { %v4379_v43 = vld [vmem:[%s4306_s15 + $0x64] ss:$8 sps:$4 sm:$0xff]   ;;  %v3472_v54 = vcombine.high %v405_v41, %v409_v42 }
  0xb8   : > { %1259 = vmatmul.mubr.bf16.gmra.mxu0 %v4346_v44  ;;  %1382 = vmatmul.mubr.bf16.gmra.mxu1 %v4346_v44  ;;  %v4399_v22 = vld [vmem:[%s4306_s15 + $0x84] ss:$8 sps:$4 sm:$0xff]  }
  0xb9   : > { %1461 = vmatpush1.bf16.msra.mxu0 %v3397_v47  ;;  %1584 = vmatpush1.bf16.msra.mxu1 %v3399_v50  ;;  %v396_v47 = vld [vmem:[#allocation5 + $0x2d0] sm:$0xff]  ;;  %v3470_v50 = vcombine.high %v404_v38, %v408_v39  ;;  %v373_v23 = vld [vmem:[#allocation5 + $0x218] sm:$0xff] }
  0xba   : > { %1268 = vmatprep.mubr.bf16.mxu0 %v4349_v51  ;;  %1391 = vmatprep.mubr.bf16.mxu1 %v4349_v51  ;;  %v3462_v58 = vcombine.high %v396_v47, %v400_v48  ;;  %v3461_v3 = vcombine.low %v396_v47, %v400_v48  ;;  %v3760_v47 = vld [vmem:[#allocation8 + $0x50] ss:$8 sps:$4 sm:$0xff]  }
  0xbb   : > { %1462 = vmatprep.subr.bf16.mxu0 %v3390_v52  ;;  %1585 = vmatprep.subr.bf16.mxu1 %v3392_v55  ;;  %v397_v52 = vld [vmem:[#allocation5 + $0x2d8] sm:$0xff]  ;;  %v3469_v55 = vcombine.low %v404_v38, %v408_v39 }
  0xbc   : > { %v3463_v4 = vcombine.low %v397_v52, %v401_v53  ;;  %v3748_v38 = vld [vmem:[#allocation8 + $0x70] ss:$8 sps:$4 sm:$0xff]  }
  0xbd   : > { %1463 = vmatpush1.bf16.msra.mxu0 %v3389_v59  ;;  %1586 = vmatpush1.bf16.msra.mxu1 %v3391_v60  ;;  %v388_v59 = vld [vmem:[#allocation5 + $0x290] sm:$0xff]  ;;  %v3751_v39 = vld [vmem:[#allocation8 + $0x170] ss:$8 sps:$4 sm:$0xff]  }
  0xbe   : > { %1464 = vmatprep.subr.bf16.mxu0 %v3382_v61  ;;  %1587 = vmatprep.subr.bf16.mxu1 %v3384_v62  ;;  %v392_v60 = vld [vmem:[#allocation5 + $0x2b0] sm:$0xff]  ;;  %v3471_v61 = vcombine.low %v405_v41, %v409_v42  ;;  %v3763_v48 = vld [vmem:[#allocation8 + $0x150] ss:$8 sps:$4 sm:$0xff]  }
  0xbf   : > { %v4389_v62 = vld [vmem:[%s4306_s15 + $0x74] ss:$8 sps:$4 sm:$0xff]   ;;  %v3453_v13 = vcombine.low %v388_v59, %v392_v60  ;;  %v3754_v42 = vld [vmem:[#allocation8 + $0x60] ss:$8 sps:$4 sm:$0xff]  }
  0xc0   : > { %1269 = vmatmul.mubr.bf16.gmra.mxu0 %v4356_v63  ;;  %1392 = vmatmul.mubr.bf16.gmra.mxu1 %v4356_v63  ;;  %v3759_v41 = vld [vmem:[#allocation8 + $0x164] ss:$8 sps:$4 sm:$0xff]  }
  0xc1   : > { %1465 = vmatpush1.bf16.msra.mxu0 %v3381_v2  ;;  %1588 = vmatpush1.bf16.msra.mxu1 %v3383_v5  ;;  %v3464_v2 = vcombine.high %v397_v52, %v401_v53  ;;  %v3454_v5 = vcombine.high %v388_v59, %v392_v60  ;;  %v3774_v52 = vld [vmem:[#allocation8 + $0x34] ss:$8 sps:$4 sm:$0xff]   ;;  %v3781_v59 = vld [vmem:[#allocation8 + $0x120] ss:$8 sps:$4 sm:$0xff]  }
  0xc2   : > { %1278 = vmatprep.mubr.bf16.mxu0 %v4359_v6  ;;  %1401 = vmatprep.mubr.bf16.mxu1 %v4359_v6  ;;  %v3777_v53 = vld [vmem:[#allocation8 + $0x134] ss:$8 sps:$4 sm:$0xff]  }
  0xc3   : > { %1466 = vmatprep.subr.bf16.mxu0 %v3374_v7  ;;  %1589 = vmatprep.subr.bf16.mxu1 %v3376_v11  ;;  %v3456_v7 = vcombine.high %v389_v0, %v393_v1  ;;  %v381_v11 = vld [vmem:[#allocation5 + $0x258] sm:$0xff] }
  0xc4   : > { %v3448_v19 = vcombine.high %v381_v11, %v385_v12  ;;  %v3447_v28 = vcombine.low %v381_v11, %v385_v12  ;;  %v3786_v60 = vld [vmem:[#allocation8 + $0x14] ss:$8 sps:$4 sm:$0xff]   ;;  %v3805_v11 = vld [vmem:[#allocation8 + $0x1e0] ss:$8 sps:$4 sm:$0xff]  }
  0xc5   : > { %1467 = vmatpush1.bf16.msra.mxu0 %v3373_v15  ;;  %1590 = vmatpush1.bf16.msra.mxu1 %v3375_v17  ;;  %v3455_v15 = vcombine.low %v389_v0, %v393_v1  ;;  %v3446_v17 = vcombine.high %v380_v9, %v384_v10  ;;  %v3784_v0 = vld [vmem:[#allocation8 + $0x10] ss:$8 sps:$4 sm:$0xff]   ;;  %v3804_v10 = vld [vmem:[#allocation8 + $0xe4] ss:$8 sps:$4 sm:$0xff]   ;;  %v3810_v12 = vld [vmem:[#allocation8 + $0xd4] ss:$8 sps:$4 sm:$0xff]  }
  0xc6   : > { %1468 = vmatprep.subr.bf16.mxu0 %v3494_v18  ;;  %1591 = vmatprep.subr.bf16.mxu1 %v3496_v21  ;;  %v4396_v18 = vld [vmem:[%s4306_s15 + $0x70] ss:$8 sps:$4 sm:$0xff]  }
  0xc7   : > { %v376_v21 = vld [vmem:[#allocation5 + $0x230] sm:$0xff]  ;;  %v3787_v1 = vld [vmem:[#allocation8 + $0x110] ss:$8 sps:$4 sm:$0xff]  }
  0xc8   : > { %1279 = vmatmul.mubr.bf16.gmra.mxu0 %v4365_v16  ;;  %1402 = vmatmul.mubr.bf16.gmra.mxu1 %v4365_v16  ;;  %v3437_v31 = vcombine.low %v372_v20, %v376_v21  ;;  %v3799_v9 = vld [vmem:[#allocation8 + $0x1f0] ss:$8 sps:$4 sm:$0xff]  }
  0xc9   : > { %1469 = vmatpush2.bf16.msra.mxu0 %v3493_v25  ;;  %1288 = vmatprep.mubr.bf16.mxu0 %v4369_v24  ;;  %v377_v25 = vld [vmem:[#allocation5 + $0x238] sm:$0xff] }
  0xca   : > { %1411 = vmatprep.mubr.bf16.mxu1 %v4369_v24  ;;  %1592 = vmatpush2.bf16.msra.mxu1 %v3495_v29  ;;  %v3438_v29 = vcombine.high %v372_v20, %v376_v21  ;;  %v3439_v33 = vcombine.low %v373_v23, %v377_v25  ;;  %v3817_v20 = vld [vmem:[#allocation8 + $0x1c0] ss:$8 sps:$4 sm:$0xff]   ;;  %v3822_v21 = vld [vmem:[#allocation8 + $0xb4] ss:$8 sps:$4 sm:$0xff]  }
  0xcb   : > { %1470 = vmatprep.subr.bf16.mxu0 %v3486_v30  ;;  %1593 = vmatprep.subr.bf16.mxu1 %v3488_v34  ;;  %v3440_v30 = vcombine.high %v373_v23, %v377_v25  ;;  %v3750_v34 = vld [vmem:[#allocation8 + $0x74] ss:$8 sps:$4 sm:$0xff]   ;;  %v3820_v25 = vld [vmem:[#allocation8 + $0xb0] ss:$8 sps:$4 sm:$0xff]  }
  0xcc   : > { %v3825_v23 = vld [vmem:[#allocation8 + $0x1b4] ss:$8 sps:$4 sm:$0xff]  }
  0xcd   : > { %1471 = vmatpush2.bf16.msra.mxu0 %v3485_v35  ;;  %v4406_v35 = vld [vmem:[%s4306_s15 + $0x80] ss:$8 sps:$4 sm:$0xff]  }
  0xce   : > { %1472 = vmatprep.subr.bf16.mxu0 %v3478_v37  ;;  %1594 = vmatpush2.bf16.msra.mxu1 %v3487_v40  ;;  %v3753_v37 = vld [vmem:[#allocation8 + $0x174] ss:$8 sps:$4 sm:$0xff]   ;;  %v3756_v40 = vld [vmem:[#allocation8 + $0x64] ss:$8 sps:$4 sm:$0xff]  }
  0xcf   : > { %1595 = vmatprep.subr.bf16.mxu1 %v3480_v45  ;;  %v3757_v45 = vld [vmem:[#allocation8 + $0x160] ss:$8 sps:$4 sm:$0xff]  }
  0xd0   : > { %1289 = vmatmul.mubr.bf16.gmra.mxu0 %v4376_v36  ;;  %1412 = vmatmul.mubr.bf16.gmra.mxu1 %v4376_v36 }
  0xd1   : > { %1473 = vmatpush2.bf16.msra.mxu0 %v3477_v46  ;;  %1298 = vmatprep.mubr.bf16.mxu0 %v4379_v43  ;;  %v3762_v46 = vld [vmem:[#allocation8 + $0x54] ss:$8 sps:$4 sm:$0xff]  }
  0xd2   : > { %1421 = vmatprep.mubr.bf16.mxu1 %v4379_v43  ;;  %1596 = vmatpush2.bf16.msra.mxu1 %v3479_v49  ;;  %v3768_v49 = vld [vmem:[#allocation8 + $0x44] ss:$8 sps:$4 sm:$0xff]  }
  0xd3   : > { %1474 = vmatprep.subr.bf16.mxu0 %v3470_v50  ;;  %1597 = vmatprep.subr.bf16.mxu1 %v3472_v54  ;;  %v3769_v50 = vld [vmem:[#allocation8 + $0x140] ss:$8 sps:$4 sm:$0xff]   ;;  %v3772_v54 = vld [vmem:[#allocation8 + $0x30] ss:$8 sps:$4 sm:$0xff]  }
  0xd5   : > { %1475 = vmatpush2.bf16.msra.mxu0 %v3469_v55  ;;  %v3775_v55 = vld [vmem:[#allocation8 + $0x130] ss:$8 sps:$4 sm:$0xff]  }
  0xd6   : > { %1476 = vmatprep.subr.bf16.mxu0 %v3462_v58  ;;  %1598 = vmatpush2.bf16.msra.mxu1 %v3471_v61  ;;  %v3780_v58 = vld [vmem:[#allocation8 + $0x24] ss:$8 sps:$4 sm:$0xff]   ;;  %v3789_v61 = vld [vmem:[#allocation8 + $0x114] ss:$8 sps:$4 sm:$0xff]  }
  0xd7   : > { %1599 = vmatprep.subr.bf16.mxu1 %v3464_v2  ;;  %v3792_v2 = vld [vmem:[#allocation8 + $0x4] ss:$8 sps:$4 sm:$0xff]  }
  0xd8   : > { %1299 = vmatmul.mubr.bf16.gmra.mxu0 %v4386_v57  ;;  %1422 = vmatmul.mubr.bf16.gmra.mxu1 %v4386_v57 }
  0xd9   : > { %1308 = vmatprep.mubr.bf16.mxu0 %v4389_v62  ;;  %1431 = vmatprep.mubr.bf16.mxu1 %v4389_v62 }
  0xda   : > { %1477 = vmatpush2.bf16.msra.mxu0 %v3461_v3  ;;  %1600 = vmatpush2.bf16.msra.mxu1 %v3463_v4  ;;  %v3793_v3 = vld [vmem:[#allocation8 + $0x100] ss:$8 sps:$4 sm:$0xff]   ;;  %v3798_v4 = vld [vmem:[#allocation8 + $0xf4] ss:$8 sps:$4 sm:$0xff]  }
  0xdb   : > { %1478 = vmatprep.subr.bf16.mxu0 %v3454_v5  ;;  %1601 = vmatprep.subr.bf16.mxu1 %v3456_v7  ;;  %v3801_v5 = vld [vmem:[#allocation8 + $0x1f4] ss:$8 sps:$4 sm:$0xff]   ;;  %v3796_v7 = vld [vmem:[#allocation8 + $0xf0] ss:$8 sps:$4 sm:$0xff]  }
  0xde   : > { %1479 = vmatpush2.bf16.msra.mxu0 %v3453_v13  ;;  %1602 = vmatpush2.bf16.msra.mxu1 %v3455_v15  ;;  %v3813_v13 = vld [vmem:[#allocation8 + $0x1d4] ss:$8 sps:$4 sm:$0xff]   ;;  %v3808_v15 = vld [vmem:[#allocation8 + $0xd0] ss:$8 sps:$4 sm:$0xff]  }
  0xdf   : > { %1480 = vmatprep.subr.bf16.mxu0 %v3446_v17  ;;  %1603 = vmatprep.subr.bf16.mxu1 %v3448_v19  ;;  %v3811_v17 = vld [vmem:[#allocation8 + $0x1d0] ss:$8 sps:$4 sm:$0xff]   ;;  %v3816_v19 = vld [vmem:[#allocation8 + $0xc4] ss:$8 sps:$4 sm:$0xff]  }
  0xe0   : > { %1309 = vmatmul.mubr.bf16.gmra.mxu0 %v4396_v18  ;;  %1432 = vmatmul.mubr.bf16.gmra.mxu1 %v4396_v18 }
  0xe1   : > { %1318 = vmatprep.mubr.bf16.mxu0 %v4399_v22  ;;  %1441 = vmatprep.mubr.bf16.mxu1 %v4399_v22 }
  0xe2   : > { %1481 = vmatpush2.bf16.msra.mxu0 %v3445_v27  ;;  %1604 = vmatpush2.bf16.msra.mxu1 %v3447_v28  ;;  %v3823_v27 = vld [vmem:[#allocation8 + $0x1b0] ss:$8 sps:$4 sm:$0xff]   ;;  %v3828_v28 = vld [vmem:[#allocation8 + $0xa4] ss:$8 sps:$4 sm:$0xff]  }
  0xe3   : > { %1482 = vmatprep.subr.bf16.mxu0 %v3438_v29  ;;  %1605 = vmatprep.subr.bf16.mxu1 %v3440_v30  ;;  %v3829_v29 = vld [vmem:[#allocation8 + $0x1a0] ss:$8 sps:$4 sm:$0xff]   ;;  %v3834_v30 = vld [vmem:[#allocation8 + $0x94] ss:$8 sps:$4 sm:$0xff]  }
  0xe6   : > { %1483 = vmatpush2.bf16.msra.mxu0 %v3437_v31  ;;  %1606 = vmatpush2.bf16.msra.mxu1 %v3439_v33  ;;  %v3837_v31 = vld [vmem:[#allocation8 + $0x194] ss:$8 sps:$4 sm:$0xff]   ;;  %v3832_v33 = vld [vmem:[#allocation8 + $0x90] ss:$8 sps:$4 sm:$0xff]  }
  0xe7   : > { %2694 = vmatprep.subr.bf16.mxu0 %v3750_v34  ;;  %2817 = vmatprep.subr.bf16.mxu1 %v3753_v37  ;;  %v3835_v34 = vld [vmem:[#allocation8 + $0x190] ss:$8 sps:$4 sm:$0xff]   ;;  %v3840_v37 = vld [vmem:[#allocation8 + $0x84] ss:$8 sps:$4 sm:$0xff]  }
  0xe8   : > { %1319 = vmatmul.mubr.bf16.gmra.mxu0 %v4406_v35  ;;  %1442 = vmatmul.mubr.bf16.gmra.mxu1 %v4406_v35 }
  0xe9   : > { %1484 = vmatprep.mubr.bf16.mxu0 %v4321_v56  ;;  %1607 = vmatprep.mubr.bf16.mxu1 %v4321_v56  ;;  %v3765_v56 = vld [vmem:[#allocation8 + $0x154] ss:$8 sps:$4 sm:$0xff]  }
  0xf0   : > { %1485 = vmatmul.mubr.bf16.vlgmr.msra.gmra.mxu0 %v4326_v8  ;;  %1608 = vmatmul.mubr.bf16.vlgmr.msra.gmra.mxu1 %v4326_v8  ;;  %v3771_v8 = vld [vmem:[#allocation8 + $0x144] ss:$8 sps:$4 sm:$0xff]  }
  0xf1   : > { %1494 = vmatprep.mubr.bf16.mxu0 %v4329_v14  ;;  %1617 = vmatprep.mubr.bf16.mxu1 %v4329_v14  ;;  %v3766_v14 = vld [vmem:[#allocation8 + $0x40] ss:$8 sps:$4 sm:$0xff]  }
  0xf2   : > { %2695 = vmatpush1.bf16.msra.mxu0 %v3748_v38  ;;  %2818 = vmatpush1.bf16.msra.mxu1 %v3751_v39  ;;  %v3841_v38 = vld [vmem:[#allocation8 + $0x180] ss:$8 sps:$4 sm:$0xff]   ;;  %v3846_v39 = vld [vmem:[#allocation8 + $0x274] ss:$8 sps:$4 sm:$0xff]  }
  0xf3   : > { %2696 = vmatprep.subr.bf16.mxu0 %v3756_v40  ;;  %2819 = vmatprep.subr.bf16.mxu1 %v3759_v41  ;;  %v3849_v40 = vld [vmem:[#allocation8 + $0x374] ss:$8 sps:$4 sm:$0xff]  }
  0xf6   : > { %2697 = vmatpush1.bf16.msra.mxu0 %v3754_v42  ;;  %2820 = vmatpush1.bf16.msra.mxu1 %v3757_v45 }
  0xf7   : > { %2698 = vmatprep.subr.bf16.mxu0 %v3762_v46  ;;  %2821 = vmatprep.subr.bf16.mxu1 %v3765_v56  ;;  %v4451_v46 = vld [vmem:[#allocation7] sm:$0xff] }
  0xf8   : > { %1495 = vmatmul.mubr.bf16.gmra.mxu0 %v4334_v26  ;;  %1618 = vmatmul.mubr.bf16.gmra.mxu1 %v4334_v26  ;;  %v3783_v26 = vld [vmem:[#allocation8 + $0x124] ss:$8 sps:$4 sm:$0xff]  }
  0xf9   : > { %1504 = vmatprep.mubr.bf16.mxu0 %v4339_v32  ;;  %1627 = vmatprep.mubr.bf16.mxu1 %v4339_v32  ;;  %v3778_v32 = vld [vmem:[#allocation8 + $0x20] ss:$8 sps:$4 sm:$0xff]  }
  0xfa   : > { %2699 = vmatpush1.bf16.msra.mxu0 %v3760_v47  ;;  %2822 = vmatpush1.bf16.msra.mxu1 %v3763_v48 }
  0xfb   : > { %2700 = vmatprep.subr.bf16.mxu0 %v3768_v49  ;;  %2823 = vmatprep.subr.bf16.mxu1 %v3771_v8 }
  0xfe   : > { %2701 = vmatpush1.bf16.msra.mxu0 %v3766_v14  ;;  %2824 = vmatpush1.bf16.msra.mxu1 %v3769_v50 }
  0xff   : > { %2702 = vmatprep.subr.bf16.mxu0 %v3774_v52  ;;  %2825 = vmatprep.subr.bf16.mxu1 %v3777_v53 }
 0x100   : > { %1505 = vmatmul.mubr.bf16.gmra.mxu0 %v4346_v44  ;;  %1628 = vmatmul.mubr.bf16.gmra.mxu1 %v4346_v44  ;;  %v3795_v44 = vld [vmem:[#allocation8 + $0x104] ss:$8 sps:$4 sm:$0xff]  }
 0x101   : > { %1514 = vmatprep.mubr.bf16.mxu0 %v4349_v51  ;;  %1637 = vmatprep.mubr.bf16.mxu1 %v4349_v51  ;;  %v3790_v51 = vld [vmem:[#allocation8] ss:$8 sps:$4 sm:$0xff]  }
 0x102   : > { %2703 = vmatpush1.bf16.msra.mxu0 %v3772_v54  ;;  %2826 = vmatpush1.bf16.msra.mxu1 %v3775_v55 }
 0x103   : > { %2704 = vmatprep.subr.bf16.mxu0 %v3780_v58  ;;  %2827 = vmatprep.subr.bf16.mxu1 %v3783_v26 }
 0x106   : > { %2705 = vmatpush1.bf16.msra.mxu0 %v3778_v32  ;;  %2828 = vmatpush1.bf16.msra.mxu1 %v3781_v59 }
 0x107   : > { %2706 = vmatprep.subr.bf16.mxu0 %v3786_v60  ;;  %2829 = vmatprep.subr.bf16.mxu1 %v3789_v61 }
 0x108   : > { %1515 = vmatmul.mubr.bf16.gmra.mxu0 %v4356_v63  ;;  %1638 = vmatmul.mubr.bf16.gmra.mxu1 %v4356_v63  ;;  %v3807_v63 = vld [vmem:[#allocation8 + $0x1e4] ss:$8 sps:$4 sm:$0xff]  }
 0x109   : > { %1524 = vmatprep.mubr.bf16.mxu0 %v4359_v6  ;;  %1647 = vmatprep.mubr.bf16.mxu1 %v4359_v6  ;;  %v3802_v6 = vld [vmem:[#allocation8 + $0xe0] ss:$8 sps:$4 sm:$0xff]  }
 0x10a   : > { %2707 = vmatpush1.bf16.msra.mxu0 %v3784_v0  ;;  %2830 = vmatpush1.bf16.msra.mxu1 %v3787_v1 }
 0x10b   : > { %2708 = vmatprep.subr.bf16.mxu0 %v3792_v2  ;;  %2831 = vmatprep.subr.bf16.mxu1 %v3795_v44 }
 0x10e   : > { %2709 = vmatpush1.bf16.msra.mxu0 %v3790_v51  ;;  %2832 = vmatpush1.bf16.msra.mxu1 %v3793_v3 }
 0x10f   : > { %2710 = vmatprep.subr.bf16.mxu0 %v3798_v4  ;;  %2833 = vmatprep.subr.bf16.mxu1 %v3801_v5 }
 0x110   : > { %1525 = vmatmul.mubr.bf16.gmra.mxu0 %v4365_v16  ;;  %1648 = vmatmul.mubr.bf16.gmra.mxu1 %v4365_v16  ;;  %v3819_v16 = vld [vmem:[#allocation8 + $0x1c4] ss:$8 sps:$4 sm:$0xff]  }
 0x111   : > { %1534 = vmatprep.mubr.bf16.mxu0 %v4369_v24  ;;  %1657 = vmatprep.mubr.bf16.mxu1 %v4369_v24  ;;  %v3814_v24 = vld [vmem:[#allocation8 + $0xc0] ss:$8 sps:$4 sm:$0xff]  }
 0x112   : > { %2711 = vmatpush2.bf16.msra.mxu0 %v3796_v7  ;;  %2834 = vmatpush2.bf16.msra.mxu1 %v3799_v9 }
 0x113   : > { %2712 = vmatprep.subr.bf16.mxu0 %v3804_v10  ;;  %2835 = vmatprep.subr.bf16.mxu1 %v3807_v63 }
 0x116   : > { %2713 = vmatpush2.bf16.msra.mxu0 %v3802_v6  ;;  %2836 = vmatpush2.bf16.msra.mxu1 %v3805_v11 }
 0x117   : > { %2714 = vmatprep.subr.bf16.mxu0 %v3810_v12  ;;  %2837 = vmatprep.subr.bf16.mxu1 %v3813_v13 }
 0x118   : > { %1535 = vmatmul.mubr.bf16.gmra.mxu0 %v4376_v36  ;;  %1658 = vmatmul.mubr.bf16.gmra.mxu1 %v4376_v36  ;;  %v3831_v36 = vld [vmem:[#allocation8 + $0x1a4] ss:$8 sps:$4 sm:$0xff]  }
 0x119   : > { %1544 = vmatprep.mubr.bf16.mxu0 %v4379_v43  ;;  %1667 = vmatprep.mubr.bf16.mxu1 %v4379_v43  ;;  %v3826_v43 = vld [vmem:[#allocation8 + $0xa0] ss:$8 sps:$4 sm:$0xff]  }
 0x11a   : > { %2715 = vmatpush2.bf16.msra.mxu0 %v3808_v15  ;;  %2838 = vmatpush2.bf16.msra.mxu1 %v3811_v17  ;;  %v3844_v15 = vld [vmem:[#allocation8 + $0x270] ss:$8 sps:$4 sm:$0xff]  }
 0x11b   : > { %2716 = vmatprep.subr.bf16.mxu0 %v3816_v19  ;;  %2839 = vmatprep.subr.bf16.mxu1 %v3819_v16 }
 0x11e   : > { %2717 = vmatpush2.bf16.msra.mxu0 %v3814_v24  ;;  %2840 = vmatpush2.bf16.msra.mxu1 %v3817_v20  ;;  %v3847_v24 = vld [vmem:[#allocation8 + $0x370] ss:$8 sps:$4 sm:$0xff]   ;;  %v3852_v20 = vld [vmem:[#allocation8 + $0x264] ss:$8 sps:$4 sm:$0xff]  }
 0x11f   : > { %2718 = vmatprep.subr.bf16.mxu0 %v3822_v21  ;;  %2841 = vmatprep.subr.bf16.mxu1 %v3825_v23 }
 0x120   : > { %1545 = vmatmul.mubr.bf16.gmra.mxu0 %v4386_v57  ;;  %1668 = vmatmul.mubr.bf16.gmra.mxu1 %v4386_v57  ;;  %v3843_v57 = vld [vmem:[#allocation8 + $0x184] ss:$8 sps:$4 sm:$0xff]  }
 0x121   : > { %1554 = vmatprep.mubr.bf16.mxu0 %v4389_v62  ;;  %1677 = vmatprep.mubr.bf16.mxu1 %v4389_v62  ;;  %v3838_v62 = vld [vmem:[#allocation8 + $0x80] ss:$8 sps:$4 sm:$0xff]  }
 0x122   : > { %2719 = vmatpush2.bf16.msra.mxu0 %v3820_v25  ;;  %2842 = vmatpush2.bf16.msra.mxu1 %v3823_v27 }
 0x123   : > { %2720 = vmatprep.subr.bf16.mxu0 %v3828_v28  ;;  %2843 = vmatprep.subr.bf16.mxu1 %v3831_v36  ;;  %v3855_v28 = vld [vmem:[#allocation8 + $0x364] ss:$8 sps:$4 sm:$0xff]  }
 0x126   : > { %2721 = vmatpush2.bf16.msra.mxu0 %v3826_v43  ;;  %2844 = vmatpush2.bf16.msra.mxu1 %v3829_v29 }
 0x127   : > { %2722 = vmatprep.subr.bf16.mxu0 %v3834_v30  ;;  %2845 = vmatprep.subr.bf16.mxu1 %v3837_v31 }
 0x128   : > { %1555 = vmatmul.mubr.bf16.gmra.mxu0 %v4396_v18  ;;  %1678 = vmatmul.mubr.bf16.gmra.mxu1 %v4396_v18  ;;  %v436_v18 = vlaneseq }
 0x129   : > { %1564 = vmatprep.mubr.bf16.mxu0 %v4399_v22  ;;  %1687 = vmatprep.mubr.bf16.mxu1 %v4399_v22 }
 0x12a   : > { %2723 = vmatpush2.bf16.msra.mxu0 %v3832_v33  ;;  %2846 = vmatpush2.bf16.msra.mxu1 %v3835_v34  ;;  %v4446_v41 = vshrl.u32 %v436_v18, 7 }
 0x12b   : > { %2724 = vmatprep.subr.bf16.mxu0 %v3840_v37  ;;  %2847 = vmatprep.subr.bf16.mxu1 %v3843_v57  ;;  %v3850_v37 = vld [vmem:[#allocation8 + $0x260] ss:$8 sps:$4 sm:$0xff]  }
 0x12c   : > { %v442_v22 = vsub.s32 1, %v4446_v41  ;;  %v438_v42 = vsub.s32 0, %v4446_v41  ;;  %v450_v45 = vsub.s32 3, %v4446_v41  ;;  %v446_v56 = vsub.s32 2, %v4446_v41 }
 0x12e   : > { %2725 = vmatpush2.bf16.msra.mxu0 %v3838_v62  ;;  %2848 = vmatpush2.bf16.msra.mxu1 %v3841_v38  ;;  %v4457_v49 = vrot.slane %v4451_v46, %v442_v22  ;;  %v4465_v14 = vrot.slane %v4451_v46, %v450_v45  ;;  %v4468_v50 = vrot.slane %v4451_v46, %v446_v56 }
 0x12f   : > { %2940 = vmatprep.subr.bf16.mxu0 %v3846_v39  ;;  %3063 = vmatprep.subr.bf16.mxu1 %v3849_v40  ;;  %v3853_v39 = vld [vmem:[#allocation8 + $0x360] ss:$8 sps:$4 sm:$0xff]   ;;  %v3858_v40 = vld [vmem:[#allocation8 + $0x254] ss:$8 sps:$4 sm:$0xff]  }
 0x130   : > { %1565 = vmatmul.mubr.bf16.gmra.mxu0 %v4406_v35  ;;  %1688 = vmatmul.mubr.bf16.gmra.mxu1 %v4406_v35  ;;  %v4462_v35 = vrot.slane %v4451_v46, %v438_v42 }
 0x168   : > { %v1240_v47 = vpop.f32.mrf.mxu0  ;;  %v1363_v48 = vpop.f32.mrf.mxu1 }
 0x169   : > { %v1241_v26 = vadd.f32 %v1240_v47, %v4462_v35  ;;  %v1364_v61 = vadd.f32 %v1363_v48, %v4468_v50  ;;  %v3861_v48 = vld [vmem:[#allocation8 + $0x354] ss:$8 sps:$4 sm:$0xff]  }
 0x16a   : > { %v1242_v8 = vpop.f32.mrf.mxu0  ;;  %v1365_v52 = vpop.f32.mrf.mxu1 }
 0x16b   : > { %v1243_v54 = vadd.f32 %v1242_v8, %v4457_v49  ;;  %v1366_v32 = vadd.f32 %v1365_v52, %v4465_v14  ;;  %v1698_v9 = vmax.f32 %v1241_v26, 0.0  ;;  %v1700_v11 = vmax.f32 %v1364_v61, 0.0 }
 0x16c   : > { %v1244_v53 = vpop.f32.mrf.mxu0  ;;  %v1367_v58 = vpop.f32.mrf.mxu1 }
 0x16d   : > { %v1245_v55 = vadd.f32 %v1244_v53, %v4462_v35  ;;  %v1368_v59 = vadd.f32 %v1367_v58, %v4468_v50  ;;  %v1699_v3 = vmax.f32 %v1243_v54, 0.0  ;;  %v1701_v10 = vmax.f32 %v1366_v32, 0.0  ;;  %v3856_v32 = vld [vmem:[#allocation8 + $0x250] ss:$8 sps:$4 sm:$0xff]  }
 0x16e   : > { %v1246_v60 = vpop.f32.mrf.mxu0  ;;  %v1369_v1 = vpop.f32.mrf.mxu1 }
 0x16f   : > { %v1247_v0 = vadd.f32 %v1246_v60, %v4457_v49  ;;  %v1706_v2 = vmax.f32 %v1245_v55, 0.0  ;;  %v1370_v44 = vadd.f32 %v1369_v1, %v4465_v14  ;;  %v1708_v4 = vmax.f32 %v1368_v59, 0.0  ;;  %v3864_v1 = vld [vmem:[#allocation8 + $0x244] ss:$8 sps:$4 sm:$0xff]  }
 0x170   : > { %v1250_v51 = vpop.f32.mrf.mxu0  ;;  %v1373_v7 = vpop.f32.mrf.mxu1 }
 0x171   : > { %v1707_v5 = vmax.f32 %v1247_v0, 0.0  ;;  %v1709_v63 = vmax.f32 %v1370_v44, 0.0  ;;  %v1842_v17 = vpack.c.bf16 %v1706_v2, %v1698_v9  ;;  %v1844_v21 = vpack.c.bf16 %v1708_v4, %v1700_v11  ;;  %v3859_v0 = vld [vmem:[#allocation8 + $0x350] ss:$8 sps:$4 sm:$0xff]   ;;  %v3867_v4 = vld [vmem:[#allocation8 + $0x344] ss:$8 sps:$4 sm:$0xff]  }
 0x172   : > { %v1252_v6 = vpop.f32.mrf.mxu0  ;;  %v1375_v12 = vpop.f32.mrf.mxu1  ;;  %v1251_v36 = vadd.f32 %v1250_v51, %v4462_v35  ;;  %v1374_v31 = vadd.f32 %v1373_v7, %v4468_v50 }
 0x173   : > { %v1843_v13 = vpack.c.bf16 %v1707_v5, %v1699_v3  ;;  %v1845_v16 = vpack.c.bf16 %v1709_v63, %v1701_v10  ;;  %v1253_v23 = vadd.f32 %v1252_v6, %v4457_v49  ;;  %v1376_v43 = vadd.f32 %v1375_v12, %v4465_v14  ;;  %v3862_v12 = vld [vmem:[#allocation8 + $0x240] ss:$8 sps:$4 sm:$0xff]  }
 0x174   : > { %v1254_v19 = vpop.f32.mrf.mxu0  ;;  %v1377_v27 = vpop.f32.mrf.mxu1  ;;  %v1714_v8 = vmax.f32 %v1251_v36, 0.0  ;;  %v1716_v55 = vmax.f32 %v1374_v31, 0.0 }
 0x175   : > { %v1255_v25 = vadd.f32 %v1254_v19, %v4462_v35  ;;  %2726 = vmatprep.mubr.bf16.mxu0 %v1843_v13  ;;  %v1378_v29 = vadd.f32 %v1377_v27, %v4468_v50  ;;  %2849 = vmatprep.mubr.bf16.mxu1 %v1845_v16  ;;  %v1715_v18 = vmax.f32 %v1253_v23, 0.0  ;;  %v1717_v52 = vmax.f32 %v1376_v43, 0.0  ;;  %v3865_v19 = vld [vmem:[#allocation8 + $0x340] ss:$8 sps:$4 sm:$0xff]   ;;  %v3870_v16 = vld [vmem:[#allocation8 + $0x234] ss:$8 sps:$4 sm:$0xff]  }
 0x176   : > { %v1256_v30 = vpop.f32.mrf.mxu0  ;;  %2727 = vmatmul.mubr.bf16.vlgmr.msra.gmra.mxu0 %v1842_v17  ;;  %v1379_v34 = vpop.f32.mrf.mxu1  ;;  %2850 = vmatmul.mubr.bf16.vlgmr.msra.gmra.mxu1 %v1844_v21 }
 0x177   : > { %v1257_v33 = vadd.f32 %v1256_v30, %v4457_v49  ;;  %2941 = vmatpush1.bf16.msra.mxu0 %v3844_v15  ;;  %v1722_v57 = vmax.f32 %v1255_v25, 0.0  ;;  %v1380_v62 = vadd.f32 %v1379_v34, %v4465_v14  ;;  %3064 = vmatpush1.bf16.msra.mxu1 %v3847_v24  ;;  %v1724_v45 = vmax.f32 %v1378_v29, 0.0  ;;  %v3873_v25 = vld [vmem:[#allocation8 + $0x334] ss:$8 sps:$4 sm:$0xff]  }
 0x178   : > { %v1260_v38 = vpop.f32.mrf.mxu0  ;;  %2942 = vmatprep.subr.bf16.mxu0 %v3852_v20  ;;  %v1383_v47 = vpop.f32.mrf.mxu1  ;;  %3065 = vmatprep.subr.bf16.mxu1 %v3855_v28 }
 0x179   : > { %v1723_v56 = vmax.f32 %v1257_v33, 0.0  ;;  %v1725_v53 = vmax.f32 %v1380_v62, 0.0  ;;  %v1850_v59 = vpack.c.bf16 %v1722_v57, %v1714_v8  ;;  %v1852_v2 = vpack.c.bf16 %v1724_v45, %v1716_v55  ;;  %v3868_v33 = vld [vmem:[#allocation8 + $0x230] ss:$8 sps:$4 sm:$0xff]  }
 0x17a   : > { %v1262_v54 = vpop.f32.mrf.mxu0  ;;  %v1385_v58 = vpop.f32.mrf.mxu1  ;;  %v1261_v5 = vadd.f32 %v1260_v38, %v4462_v35  ;;  %v1384_v63 = vadd.f32 %v1383_v47, %v4468_v50  ;;  %v3871_v62 = vld [vmem:[#allocation8 + $0x330] ss:$8 sps:$4 sm:$0xff]   ;;  %v3876_v38 = vld [vmem:[#allocation8 + $0x224] ss:$8 sps:$4 sm:$0xff]  }
 0x17b   : > { %2943 = vmatpush1.bf16.msra.mxu0 %v3850_v37  ;;  %v1851_v26 = vpack.c.bf16 %v1723_v56, %v1715_v18  ;;  %v1853_v61 = vpack.c.bf16 %v1725_v53, %v1717_v52  ;;  %3066 = vmatpush1.bf16.msra.mxu1 %v3853_v39  ;;  %v1263_v44 = vadd.f32 %v1262_v54, %v4457_v49  ;;  %v3879_v56 = vld [vmem:[#allocation8 + $0x324] ss:$8 sps:$4 sm:$0xff]  }
 0x17c   : > { %v1264_v60 = vpop.f32.mrf.mxu0  ;;  %2944 = vmatprep.subr.bf16.mxu0 %v3858_v40  ;;  %v1387_v3 = vpop.f32.mrf.mxu1  ;;  %3067 = vmatprep.subr.bf16.mxu1 %v3861_v48  ;;  %v1386_v7 = vadd.f32 %v1385_v58, %v4465_v14  ;;  %v1730_v27 = vmax.f32 %v1261_v5, 0.0  ;;  %v1732_v29 = vmax.f32 %v1384_v63, 0.0  ;;  %v3874_v58 = vld [vmem:[#allocation8 + $0x220] ss:$8 sps:$4 sm:$0xff]  }
 0x17d   : > { %v1265_v51 = vadd.f32 %v1264_v60, %v4462_v35  ;;  %2736 = vmatprep.mubr.bf16.mxu0 %v1851_v26  ;;  %v1388_v9 = vadd.f32 %v1387_v3, %v4468_v50  ;;  %2859 = vmatprep.mubr.bf16.mxu1 %v1853_v61  ;;  %v1731_v24 = vmax.f32 %v1263_v44, 0.0  ;;  %v3877_v60 = vld [vmem:[#allocation8 + $0x320] ss:$8 sps:$4 sm:$0xff]   ;;  %v3882_v61 = vld [vmem:[#allocation8 + $0x214] ss:$8 sps:$4 sm:$0xff]  }
 0x17e   : > { %v1266_v10 = vpop.f32.mrf.mxu0  ;;  %2737 = vmatmul.mubr.bf16.gmra.mxu0 %v1850_v59  ;;  %v1389_v11 = vpop.f32.mrf.mxu1  ;;  %2860 = vmatmul.mubr.bf16.gmra.mxu1 %v1852_v2  ;;  %v1733_v28 = vmax.f32 %v1386_v7, 0.0 }
 0x17f   : > { %v1267_v6 = vadd.f32 %v1266_v10, %v4457_v49  ;;  %2945 = vmatpush1.bf16.msra.mxu0 %v3856_v32  ;;  %v1738_v13 = vmax.f32 %v1265_v51, 0.0  ;;  %v1390_v15 = vadd.f32 %v1389_v11, %v4465_v14  ;;  %3068 = vmatpush1.bf16.msra.mxu1 %v3859_v0  ;;  %v1740_v20 = vmax.f32 %v1388_v9, 0.0  ;;  %v3885_v51 = vld [vmem:[#allocation8 + $0x314] ss:$8 sps:$4 sm:$0xff]  }
 0x180   : > { %v1270_v17 = vpop.f32.mrf.mxu0  ;;  %2946 = vmatprep.subr.bf16.mxu0 %v3864_v1  ;;  %v1393_v23 = vpop.f32.mrf.mxu1  ;;  %3069 = vmatprep.subr.bf16.mxu1 %v3867_v4 }
 0x181   : > { %v1739_v21 = vmax.f32 %v1267_v6, 0.0  ;;  %v1741_v36 = vmax.f32 %v1390_v15, 0.0  ;;  %v1858_v34 = vpack.c.bf16 %v1738_v13, %v1730_v27  ;;  %v1860_v39 = vpack.c.bf16 %v1740_v20, %v1732_v29  ;;  %v3880_v6 = vld [vmem:[#allocation8 + $0x210] ss:$8 sps:$4 sm:$0xff]  }
 0x182   : > { %v1272_v43 = vpop.f32.mrf.mxu0  ;;  %v1395_v30 = vpop.f32.mrf.mxu1  ;;  %v1271_v47 = vadd.f32 %v1270_v17, %v4462_v35  ;;  %v1394_v53 = vadd.f32 %v1393_v23, %v4468_v50  ;;  %v3883_v15 = vld [vmem:[#allocation8 + $0x310] ss:$8 sps:$4 sm:$0xff]   ;;  %v3888_v17 = vld [vmem:[#allocation8 + $0x204] ss:$8 sps:$4 sm:$0xff]  }
 0x183   : > { %v1859_v31 = vpack.c.bf16 %v1739_v21, %v1731_v24  ;;  %2947 = vmatpush1.bf16.msra.mxu0 %v3862_v12  ;;  %v1861_v57 = vpack.c.bf16 %v1741_v36, %v1733_v28  ;;  %3070 = vmatpush1.bf16.msra.mxu1 %v3865_v19  ;;  %v1273_v40 = vadd.f32 %v1272_v43, %v4457_v49  ;;  %v3891_v21 = vld [vmem:[#allocation8 + $0x304] ss:$8 sps:$4 sm:$0xff]  }
 0x184   : > { %v1274_v37 = vpop.f32.mrf.mxu0  ;;  %2948 = vmatprep.subr.bf16.mxu0 %v3870_v16  ;;  %v1397_v45 = vpop.f32.mrf.mxu1  ;;  %3071 = vmatprep.subr.bf16.mxu1 %v3873_v25  ;;  %v1396_v48 = vadd.f32 %v1395_v30, %v4465_v14  ;;  %v1746_v3 = vmax.f32 %v1271_v47, 0.0  ;;  %v1748_v9 = vmax.f32 %v1394_v53, 0.0  ;;  %v3886_v30 = vld [vmem:[#allocation8 + $0x200] ss:$8 sps:$4 sm:$0xff]  }
 0x185   : > { %v1275_v18 = vadd.f32 %v1274_v37, %v4462_v35  ;;  %2746 = vmatprep.mubr.bf16.mxu0 %v1859_v31  ;;  %v1398_v8 = vadd.f32 %v1397_v45, %v4468_v50  ;;  %2869 = vmatprep.mubr.bf16.mxu1 %v1861_v57  ;;  %v1747_v0 = vmax.f32 %v1273_v40, 0.0  ;;  %v3889_v37 = vld [vmem:[#allocation8 + $0x300] ss:$8 sps:$4 sm:$0xff]   ;;  %v3894_v57 = vld [vmem:[#allocation8 + $0x2f4] ss:$8 sps:$4 sm:$0xff]  }
 0x186   : > { %v1276_v52 = vpop.f32.mrf.mxu0  ;;  %2747 = vmatmul.mubr.bf16.gmra.mxu0 %v1858_v34  ;;  %v1399_v55 = vpop.f32.mrf.mxu1  ;;  %2870 = vmatmul.mubr.bf16.gmra.mxu1 %v1860_v39  ;;  %v1749_v4 = vmax.f32 %v1396_v48, 0.0 }
 0x187   : > { %v1277_v54 = vadd.f32 %v1276_v52, %v4457_v49  ;;  %2949 = vmatpush1.bf16.msra.mxu0 %v3868_v33  ;;  %v1754_v26 = vmax.f32 %v1275_v18, 0.0  ;;  %v1400_v32 = vadd.f32 %v1399_v55, %v4465_v14  ;;  %3072 = vmatpush1.bf16.msra.mxu1 %v3871_v62  ;;  %v1756_v1 = vmax.f32 %v1398_v8, 0.0  ;;  %v3897_v18 = vld [vmem:[#allocation8 + $0x3f4] ss:$8 sps:$4 sm:$0xff]  }
 0x188   : > { %v1280_v59 = vpop.f32.mrf.mxu0  ;;  %2950 = vmatprep.subr.bf16.mxu0 %v3876_v38  ;;  %v1403_v44 = vpop.f32.mrf.mxu1  ;;  %3073 = vmatprep.subr.bf16.mxu1 %v3879_v56 }
 0x189   : > { %v1755_v2 = vmax.f32 %v1277_v54, 0.0  ;;  %v1757_v5 = vmax.f32 %v1400_v32, 0.0  ;;  %v1866_v11 = vpack.c.bf16 %v1754_v26, %v1746_v3  ;;  %v1868_v19 = vpack.c.bf16 %v1756_v1, %v1748_v9  ;;  %v3892_v54 = vld [vmem:[#allocation8 + $0x2f0] ss:$8 sps:$4 sm:$0xff]  }
 0x18a   : > { %v1282_v7 = vpop.f32.mrf.mxu0  ;;  %v1405_v10 = vpop.f32.mrf.mxu1  ;;  %v1281_v23 = vadd.f32 %v1280_v59, %v4462_v35  ;;  %v1404_v36 = vadd.f32 %v1403_v44, %v4468_v50  ;;  %v3895_v32 = vld [vmem:[#allocation8 + $0x3f0] ss:$8 sps:$4 sm:$0xff]   ;;  %v3900_v59 = vld [vmem:[#allocation8 + $0x2e4] ss:$8 sps:$4 sm:$0xff]  }
 0x18b   : > { %v1867_v63 = vpack.c.bf16 %v1755_v2, %v1747_v0  ;;  %2951 = vmatpush1.bf16.msra.mxu0 %v3874_v58  ;;  %v1869_v13 = vpack.c.bf16 %v1757_v5, %v1749_v4  ;;  %3074 = vmatpush1.bf16.msra.mxu1 %v3877_v60  ;;  %v1283_v16 = vadd.f32 %v1282_v7, %v4457_v49  ;;  %v3903_v2 = vld [vmem:[#allocation8 + $0x3e4] ss:$8 sps:$4 sm:$0xff]  }
 0x18c   : > { %v1284_v12 = vpop.f32.mrf.mxu0  ;;  %2952 = vmatprep.subr.bf16.mxu0 %v3882_v61  ;;  %v1407_v20 = vpop.f32.mrf.mxu1  ;;  %3075 = vmatprep.subr.bf16.mxu1 %v3885_v51  ;;  %v1406_v25 = vadd.f32 %v1405_v10, %v4465_v14  ;;  %v1762_v45 = vmax.f32 %v1281_v23, 0.0  ;;  %v1764_v8 = vmax.f32 %v1404_v36, 0.0  ;;  %v3898_v10 = vld [vmem:[#allocation8 + $0x2e0] ss:$8 sps:$4 sm:$0xff]  }
 0x18d   : > { %v1285_v24 = vadd.f32 %v1284_v12, %v4462_v35  ;;  %2756 = vmatprep.mubr.bf16.mxu0 %v1867_v63  ;;  %v1408_v27 = vadd.f32 %v1407_v20, %v4468_v50  ;;  %2879 = vmatprep.mubr.bf16.mxu1 %v1869_v13  ;;  %v1763_v62 = vmax.f32 %v1283_v16, 0.0  ;;  %v3901_v12 = vld [vmem:[#allocation8 + $0x3e0] ss:$8 sps:$4 sm:$0xff]   ;;  %v3906_v13 = vld [vmem:[#allocation8 + $0x2d4] ss:$8 sps:$4 sm:$0xff]  }
 0x18e   : > { %v1286_v28 = vpop.f32.mrf.mxu0  ;;  %2757 = vmatmul.mubr.bf16.gmra.mxu0 %v1866_v11  ;;  %v1409_v29 = vpop.f32.mrf.mxu1  ;;  %2880 = vmatmul.mubr.bf16.gmra.mxu1 %v1868_v19  ;;  %v1765_v56 = vmax.f32 %v1406_v25, 0.0 }
 0x18f   : > { %v1287_v43 = vadd.f32 %v1286_v28, %v4457_v49  ;;  %2953 = vmatpush1.bf16.msra.mxu0 %v3880_v6  ;;  %v1770_v31 = vmax.f32 %v1285_v24, 0.0  ;;  %v1410_v33 = vadd.f32 %v1409_v29, %v4465_v14  ;;  %3076 = vmatpush1.bf16.msra.mxu1 %v3883_v15  ;;  %v1772_v38 = vmax.f32 %v1408_v27, 0.0  ;;  %v3909_v24 = vld [vmem:[#allocation8 + $0x3d4] ss:$8 sps:$4 sm:$0xff]  }
 0x190   : > { %v1290_v34 = vpop.f32.mrf.mxu0  ;;  %2954 = vmatprep.subr.bf16.mxu0 %v3888_v17  ;;  %v1413_v40 = vpop.f32.mrf.mxu1  ;;  %3077 = vmatprep.subr.bf16.mxu1 %v3891_v21 }
 0x191   : > { %v1771_v39 = vmax.f32 %v1287_v43, 0.0  ;;  %v1773_v47 = vmax.f32 %v1410_v33, 0.0  ;;  %v1874_v55 = vpack.c.bf16 %v1770_v31, %v1762_v45  ;;  %v1876_v60 = vpack.c.bf16 %v1772_v38, %v1764_v8  ;;  %v3904_v43 = vld [vmem:[#allocation8 + $0x2d0] ss:$8 sps:$4 sm:$0xff]  }
 0x192   : > { %v1292_v48 = vpop.f32.mrf.mxu0  ;;  %v1415_v52 = vpop.f32.mrf.mxu1  ;;  %v1291_v44 = vadd.f32 %v1290_v34, %v4462_v35  ;;  %v1414_v5 = vadd.f32 %v1413_v40, %v4468_v50  ;;  %v3907_v33 = vld [vmem:[#allocation8 + $0x3d0] ss:$8 sps:$4 sm:$0xff]   ;;  %v3912_v34 = vld [vmem:[#allocation8 + $0x2c4] ss:$8 sps:$4 sm:$0xff]  }
 0x193   : > { %v1875_v53 = vpack.c.bf16 %v1771_v39, %v1763_v62  ;;  %2955 = vmatpush1.bf16.msra.mxu0 %v3886_v30  ;;  %v1877_v26 = vpack.c.bf16 %v1773_v47, %v1765_v56  ;;  %3078 = vmatpush1.bf16.msra.mxu1 %v3889_v37  ;;  %v1293_v61 = vadd.f32 %v1292_v48, %v4457_v49  ;;  %v3915_v39 = vld [vmem:[#allocation8 + $0x3c4] ss:$8 sps:$4 sm:$0xff]  }
 0x194   : > { %v1294_v58 = vpop.f32.mrf.mxu0  ;;  %2956 = vmatprep.subr.bf16.mxu0 %v3894_v57  ;;  %v1417_v1 = vpop.f32.mrf.mxu1  ;;  %3079 = vmatprep.subr.bf16.mxu1 %v3897_v18  ;;  %v1416_v51 = vadd.f32 %v1415_v52, %v4465_v14  ;;  %v1778_v20 = vmax.f32 %v1291_v44, 0.0  ;;  %v1780_v27 = vmax.f32 %v1414_v5, 0.0  ;;  %v3910_v52 = vld [vmem:[#allocation8 + $0x2c0] ss:$8 sps:$4 sm:$0xff]  }
 0x195   : > { %v1295_v0 = vadd.f32 %v1294_v58, %v4462_v35  ;;  %2766 = vmatprep.mubr.bf16.mxu0 %v1875_v53  ;;  %v1418_v3 = vadd.f32 %v1417_v1, %v4468_v50  ;;  %2889 = vmatprep.mubr.bf16.mxu1 %v1877_v26  ;;  %v1779_v15 = vmax.f32 %v1293_v61, 0.0  ;;  %v3913_v58 = vld [vmem:[#allocation8 + $0x3c0] ss:$8 sps:$4 sm:$0xff]   ;;  %v3918_v26 = vld [vmem:[#allocation8 + $0x2b4] ss:$8 sps:$4 sm:$0xff]  }
 0x196   : > { %v1296_v4 = vpop.f32.mrf.mxu0  ;;  %2767 = vmatmul.mubr.bf16.gmra.mxu0 %v1874_v55  ;;  %v1419_v9 = vpop.f32.mrf.mxu1  ;;  %2890 = vmatmul.mubr.bf16.gmra.mxu1 %v1876_v60  ;;  %v1781_v21 = vmax.f32 %v1416_v51, 0.0 }
 0x197   : > { %v1297_v7 = vadd.f32 %v1296_v4, %v4457_v49  ;;  %2957 = vmatpush2.bf16.msra.mxu0 %v3892_v54  ;;  %v1786_v63 = vmax.f32 %v1295_v0, 0.0  ;;  %v1420_v6 = vadd.f32 %v1419_v9, %v4465_v14  ;;  %3080 = vmatpush2.bf16.msra.mxu1 %v3895_v32  ;;  %v1788_v17 = vmax.f32 %v1418_v3, 0.0  ;;  %v3921_v0 = vld [vmem:[#allocation8 + $0x3b4] ss:$8 sps:$4 sm:$0xff]  }
 0x198   : > { %v1300_v11 = vpop.f32.mrf.mxu0  ;;  %2958 = vmatprep.subr.bf16.mxu0 %v3900_v59  ;;  %v1423_v16 = vpop.f32.mrf.mxu1  ;;  %3081 = vmatprep.subr.bf16.mxu1 %v3903_v2 }
 0x199   : > { %v1787_v19 = vmax.f32 %v1297_v7, 0.0  ;;  %v1789_v23 = vmax.f32 %v1420_v6, 0.0  ;;  %v1882_v29 = vpack.c.bf16 %v1786_v63, %v1778_v20  ;;  %v1884_v37 = vpack.c.bf16 %v1788_v17, %v1780_v27  ;;  %v3916_v7 = vld [vmem:[#allocation8 + $0x2b0] ss:$8 sps:$4 sm:$0xff]  }
 0x19a   : > { %v1302_v25 = vpop.f32.mrf.mxu0  ;;  %v1425_v28 = vpop.f32.mrf.mxu1  ;;  %v1301_v40 = vadd.f32 %v1300_v11, %v4462_v35  ;;  %v1424_v47 = vadd.f32 %v1423_v16, %v4468_v50  ;;  %v3919_v6 = vld [vmem:[#allocation8 + $0x3b0] ss:$8 sps:$4 sm:$0xff]   ;;  %v3924_v11 = vld [vmem:[#allocation8 + $0x2a4] ss:$8 sps:$4 sm:$0xff]  }
 0x19b   : > { %v1883_v36 = vpack.c.bf16 %v1787_v19, %v1779_v15  ;;  %2959 = vmatpush2.bf16.msra.mxu0 %v3898_v10  ;;  %v1885_v31 = vpack.c.bf16 %v1789_v23, %v1781_v21  ;;  %3082 = vmatpush2.bf16.msra.mxu1 %v3901_v12  ;;  %v1303_v57 = vadd.f32 %v1302_v25, %v4457_v49  ;;  %v3927_v19 = vld [vmem:[#allocation8 + $0x3a4] ss:$8 sps:$4 sm:$0xff]  }
 0x19c   : > { %v1304_v30 = vpop.f32.mrf.mxu0  ;;  %2960 = vmatprep.subr.bf16.mxu0 %v3906_v13  ;;  %v1427_v38 = vpop.f32.mrf.mxu1  ;;  %3083 = vmatprep.subr.bf16.mxu1 %v3909_v24  ;;  %v1426_v18 = vadd.f32 %v1425_v28, %v4465_v14  ;;  %v1794_v1 = vmax.f32 %v1301_v40, 0.0  ;;  %v1796_v3 = vmax.f32 %v1424_v47, 0.0  ;;  %v3922_v28 = vld [vmem:[#allocation8 + $0x2a0] ss:$8 sps:$4 sm:$0xff]  }
 0x19d   : > { %v1305_v62 = vadd.f32 %v1304_v30, %v4462_v35  ;;  %2776 = vmatprep.mubr.bf16.mxu0 %v1883_v36  ;;  %v1428_v45 = vadd.f32 %v1427_v38, %v4468_v50  ;;  %2899 = vmatprep.mubr.bf16.mxu1 %v1885_v31  ;;  %v1795_v32 = vmax.f32 %v1303_v57, 0.0  ;;  %v3925_v30 = vld [vmem:[#allocation8 + $0x3a0] ss:$8 sps:$4 sm:$0xff]   ;;  %v3930_v31 = vld [vmem:[#allocation8 + $0x294] ss:$8 sps:$4 sm:$0xff]  }
 0x19e   : > { %v1306_v56 = vpop.f32.mrf.mxu0  ;;  %2777 = vmatmul.mubr.bf16.gmra.mxu0 %v1882_v29  ;;  %v1429_v8 = vpop.f32.mrf.mxu1  ;;  %2900 = vmatmul.mubr.bf16.gmra.mxu1 %v1884_v37  ;;  %v1797_v2 = vmax.f32 %v1426_v18, 0.0 }
 0x19f   : > { %v1307_v48 = vadd.f32 %v1306_v56, %v4457_v49  ;;  %2961 = vmatpush2.bf16.msra.mxu0 %v3904_v43  ;;  %v1802_v53 = vmax.f32 %v1305_v62, 0.0  ;;  %v1430_v54 = vadd.f32 %v1429_v8, %v4465_v14  ;;  %3084 = vmatpush2.bf16.msra.mxu1 %v3907_v33  ;;  %v1804_v59 = vmax.f32 %v1428_v45, 0.0  ;;  %v3933_v62 = vld [vmem:[#allocation8 + $0x394] ss:$8 sps:$4 sm:$0xff]  }
 0x1a0   : > { %v1310_v55 = vpop.f32.mrf.mxu0  ;;  %2962 = vmatprep.subr.bf16.mxu0 %v3912_v34  ;;  %v1433_v61 = vpop.f32.mrf.mxu1  ;;  %3085 = vmatprep.subr.bf16.mxu1 %v3915_v39 }
 0x1a1   : > { %v1803_v60 = vmax.f32 %v1307_v48, 0.0  ;;  %v1805_v44 = vmax.f32 %v1430_v54, 0.0  ;;  %v1890_v9 = vpack.c.bf16 %v1802_v53, %v1794_v1  ;;  %v1892_v12 = vpack.c.bf16 %v1804_v59, %v1796_v3  ;;  %v3928_v48 = vld [vmem:[#allocation8 + $0x290] ss:$8 sps:$4 sm:$0xff]  }
 0x1a2   : > { %v1312_v51 = vpop.f32.mrf.mxu0  ;;  %v1435_v4 = vpop.f32.mrf.mxu1  ;;  %v1311_v16 = vadd.f32 %v1310_v55, %v4462_v35  ;;  %v1434_v23 = vadd.f32 %v1433_v61, %v4468_v50  ;;  %v454_v54 = vsub.s32 4, %v4446_v41  ;;  %v3931_v55 = vld [vmem:[#allocation8 + $0x390] ss:$8 sps:$4 sm:$0xff]   ;;  %v458_v61 = vsub.s32 5, %v4446_v41 }
 0x1a3   : > { %v1891_v5 = vpack.c.bf16 %v1803_v60, %v1795_v32  ;;  %2963 = vmatpush2.bf16.msra.mxu0 %v3910_v52  ;;  %v1893_v63 = vpack.c.bf16 %v1805_v44, %v1797_v2  ;;  %3086 = vmatpush2.bf16.msra.mxu1 %v3913_v58  ;;  %v1313_v13 = vadd.f32 %v1312_v51, %v4457_v49  ;;  %v3936_v58 = vld [vmem:[#allocation8 + $0x284] ss:$8 sps:$4 sm:$0xff]   ;;  %v466_v3 = vsub.s32 7, %v4446_v41 }
 0x1a4   : > { %v1314_v10 = vpop.f32.mrf.mxu0  ;;  %2964 = vmatprep.subr.bf16.mxu0 %v3918_v26  ;;  %v1437_v17 = vpop.f32.mrf.mxu1  ;;  %3087 = vmatprep.subr.bf16.mxu1 %v3921_v0  ;;  %v1436_v24 = vadd.f32 %v1435_v4, %v4465_v14  ;;  %v1810_v38 = vmax.f32 %v1311_v16, 0.0  ;;  %v1812_v45 = vmax.f32 %v1434_v23, 0.0  ;;  %v3939_v0 = vld [vmem:[#allocation8 + $0x384] ss:$8 sps:$4 sm:$0xff]  }
 0x1a5   : > { %v1315_v15 = vadd.f32 %v1314_v10, %v4462_v35  ;;  %2786 = vmatprep.mubr.bf16.mxu0 %v1891_v5  ;;  %v1438_v20 = vadd.f32 %v1437_v17, %v4468_v50  ;;  %2909 = vmatprep.mubr.bf16.mxu1 %v1893_v63  ;;  %v1811_v33 = vmax.f32 %v1313_v13, 0.0  ;;  %v3934_v10 = vld [vmem:[#allocation8 + $0x280] ss:$8 sps:$4 sm:$0xff]   ;;  %v4550_v17 = vrot.slane %v4451_v46, %v458_v61 }
 0x1a6   : > { %v1316_v21 = vpop.f32.mrf.mxu0  ;;  %2787 = vmatmul.mubr.bf16.gmra.mxu0 %v1890_v9  ;;  %v1439_v27 = vpop.f32.mrf.mxu1  ;;  %2910 = vmatmul.mubr.bf16.gmra.mxu1 %v1892_v12  ;;  %v1813_v39 = vmax.f32 %v1436_v24, 0.0  ;;  %v462_v9 = vsub.s32 6, %v4446_v41  ;;  %v3937_v12 = vld [vmem:[#allocation8 + $0x380] ss:$8 sps:$4 sm:$0xff]  }
 0x1a7   : > { %v1317_v25 = vadd.f32 %v1316_v21, %v4457_v49  ;;  %2965 = vmatpush2.bf16.msra.mxu0 %v3916_v7  ;;  %v1818_v36 = vmax.f32 %v1315_v15, 0.0  ;;  %v1440_v43 = vadd.f32 %v1439_v27, %v4465_v14  ;;  %3088 = vmatpush2.bf16.msra.mxu1 %v3919_v6  ;;  %v1820_v34 = vmax.f32 %v1438_v20, 0.0 }
 0x1a8   : > { %v1320_v29 = vpop.f32.mrf.mxu0  ;;  %2966 = vmatprep.subr.bf16.mxu0 %v3924_v11  ;;  %v1443_v57 = vpop.f32.mrf.mxu1  ;;  %3089 = vmatprep.subr.bf16.mxu1 %v3927_v19  ;;  %v4547_v6 = vrot.slane %v4451_v46, %v454_v54 }
 0x1a9   : > { %v1819_v37 = vmax.f32 %v1317_v25, 0.0  ;;  %v1821_v40 = vmax.f32 %v1440_v43, 0.0  ;;  %v1898_v8 = vpack.c.bf16 %v1818_v36, %v1810_v38  ;;  %v1900_v26 = vpack.c.bf16 %v1820_v34, %v1812_v45 }
 0x1aa   : > { %v1322_v18 = vpop.f32.mrf.mxu0  ;;  %v1445_v56 = vpop.f32.mrf.mxu1  ;;  %v1321_v1 = vadd.f32 %v1320_v29, %v4462_v35  ;;  %v1444_v4 = vadd.f32 %v1443_v57, %v4468_v50  ;;  %v4556_v25 = vrot.slane %v4451_v46, %v462_v9 }
 0x1ab   : > { %v1899_v47 = vpack.c.bf16 %v1819_v37, %v1811_v33  ;;  %2967 = vmatpush2.bf16.msra.mxu0 %v3922_v28  ;;  %v1901_v53 = vpack.c.bf16 %v1821_v40, %v1813_v39  ;;  %3090 = vmatpush2.bf16.msra.mxu1 %v3925_v30  ;;  %v1323_v32 = vadd.f32 %v1322_v18, %v4457_v49 }
 0x1ac   : > { %v1324_v52 = vpop.f32.mrf.mxu0  ;;  %2968 = vmatprep.subr.bf16.mxu0 %v3930_v31  ;;  %v1447_v60 = vpop.f32.mrf.mxu1  ;;  %3091 = vmatprep.subr.bf16.mxu1 %v3933_v62  ;;  %v1446_v2 = vadd.f32 %v1445_v56, %v4465_v14  ;;  %v1826_v19 = vmax.f32 %v1321_v1, 0.0  ;;  %v1828_v21 = vmax.f32 %v1444_v4, 0.0 }
 0x1ad   : > { %v1325_v59 = vadd.f32 %v1324_v52, %v4462_v35  ;;  %2796 = vmatprep.mubr.bf16.mxu0 %v1899_v47  ;;  %v1448_v44 = vadd.f32 %v1447_v60, %v4468_v50  ;;  %2919 = vmatprep.mubr.bf16.mxu1 %v1901_v53  ;;  %v1827_v13 = vmax.f32 %v1323_v32, 0.0 }
 0x1ae   : > { %v1326_v51 = vpop.f32.mrf.mxu0  ;;  %2797 = vmatmul.mubr.bf16.gmra.mxu0 %v1898_v8  ;;  %v1449_v7 = vpop.f32.mrf.mxu1  ;;  %2920 = vmatmul.mubr.bf16.gmra.mxu1 %v1900_v26  ;;  %v1829_v16 = vmax.f32 %v1446_v2, 0.0 }
 0x1af   : > { %v1327_v5 = vadd.f32 %v1326_v51, %v4457_v49  ;;  %2969 = vmatpush2.bf16.msra.mxu0 %v3928_v48  ;;  %v1834_v35 = vmax.f32 %v1325_v59, 0.0  ;;  %v1450_v63 = vadd.f32 %v1449_v7, %v4465_v14  ;;  %3092 = vmatpush2.bf16.msra.mxu1 %v3931_v55  ;;  %v1836_v50 = vmax.f32 %v1448_v44, 0.0 }
 0x1b0   : > { %v1486_v11 = vpop.f32.mrf.mxu0  ;;  %2970 = vmatprep.subr.bf16.mxu0 %v3936_v58  ;;  %v1609_v49 = vpop.f32.mrf.mxu1  ;;  %3093 = vmatprep.subr.bf16.mxu1 %v3939_v0  ;;  %v4553_v14 = vrot.slane %v4451_v46, %v466_v3 }
 0x1b1   : > { %v1835_v15 = vmax.f32 %v1327_v5, 0.0  ;;  %v1837_v24 = vmax.f32 %v1450_v63, 0.0  ;;  %v1906_v28 = vpack.c.bf16 %v1834_v35, %v1826_v19  ;;  %v1908_v29 = vpack.c.bf16 %v1836_v50, %v1828_v21 }
 0x1b2   : > { %v1488_v20 = vpop.f32.mrf.mxu0  ;;  %v1611_v27 = vpop.f32.mrf.mxu1  ;;  %v1487_v34 = vadd.f32 %v1486_v11, %v4547_v6  ;;  %v1610_v62 = vadd.f32 %v1609_v49, %v4556_v25 }
 0x1b3   : > { %v1907_v23 = vpack.c.bf16 %v1835_v15, %v1827_v13  ;;  %2971 = vmatpush2.bf16.msra.mxu0 %v3934_v10  ;;  %v1909_v36 = vpack.c.bf16 %v1837_v24, %v1829_v16  ;;  %3094 = vmatpush2.bf16.msra.mxu1 %v3937_v12  ;;  %v1489_v30 = vadd.f32 %v1488_v20, %v4550_v17 }
 0x1b4   : > { %v1490_v43 = vpop.f32.mrf.mxu0  ;;  %v1613_v33 = vpop.f32.mrf.mxu1  ;;  %v1612_v37 = vadd.f32 %v1611_v27, %v4553_v14  ;;  %v1702_v52 = vmax.f32 %v1487_v34, 0.0  ;;  %v1704_v58 = vmax.f32 %v1610_v62, 0.0 }
 0x1b5   : > { %v1491_v31 = vadd.f32 %v1490_v43, %v4547_v6  ;;  %2806 = vmatprep.mubr.bf16.mxu0 %v1907_v23  ;;  %v1614_v46 = vadd.f32 %v1613_v33, %v4556_v25  ;;  %2929 = vmatprep.mubr.bf16.mxu1 %v1909_v36  ;;  %v1703_v56 = vmax.f32 %v1489_v30, 0.0 }
 0x1b6   : > { %v1492_v57 = vpop.f32.mrf.mxu0  ;;  %2807 = vmatmul.mubr.bf16.gmra.mxu0 %v1906_v28  ;;  %v1615_v39 = vpop.f32.mrf.mxu1  ;;  %2930 = vmatmul.mubr.bf16.gmra.mxu1 %v1908_v29  ;;  %v1705_v53 = vmax.f32 %v1612_v37, 0.0 }
 0x1b7   : > { %v1493_v38 = vadd.f32 %v1492_v57, %v4550_v17  ;;  %v1710_v40 = vmax.f32 %v1491_v31, 0.0  ;;  %v1616_v18 = vadd.f32 %v1615_v39, %v4553_v14  ;;  %v1712_v47 = vmax.f32 %v1614_v46, 0.0 }
 0x1b8   : > { %v1496_v45 = vpop.f32.mrf.mxu0  ;;  %v1619_v8 = vpop.f32.mrf.mxu1 }
 0x1b9   : > { %v1711_v48 = vmax.f32 %v1493_v38, 0.0  ;;  %v1713_v54 = vmax.f32 %v1616_v18, 0.0  ;;  %v1846_v59 = vpack.c.bf16 %v1710_v40, %v1702_v52  ;;  %v1848_v0 = vpack.c.bf16 %v1712_v47, %v1704_v58 }
 0x1ba   : > { %v1498_v55 = vpop.f32.mrf.mxu0  ;;  %v1621_v32 = vpop.f32.mrf.mxu1  ;;  %v1497_v51 = vadd.f32 %v1496_v45, %v4547_v6  ;;  %v1620_v7 = vadd.f32 %v1619_v8, %v4556_v25 }
 0x1bb   : > { %v1847_v26 = vpack.c.bf16 %v1711_v48, %v1703_v56  ;;  %v1849_v60 = vpack.c.bf16 %v1713_v54, %v1705_v53  ;;  %v1499_v1 = vadd.f32 %v1498_v55, %v4550_v17  ;;  %v1622_v3 = vadd.f32 %v1621_v32, %v4553_v14 }
 0x1bc   : > { %v1500_v61 = vpop.f32.mrf.mxu0  ;;  %v1623_v44 = vpop.f32.mrf.mxu1  ;;  %v1718_v49 = vmax.f32 %v1497_v51, 0.0  ;;  %v1720_v20 = vmax.f32 %v1620_v7, 0.0 }
 0x1bd   : > { %v1501_v2 = vadd.f32 %v1500_v61, %v4547_v6  ;;  %2972 = vmatprep.mubr.bf16.mxu0 %v1847_v26  ;;  %v1624_v4 = vadd.f32 %v1623_v44, %v4556_v25  ;;  %3095 = vmatprep.mubr.bf16.mxu1 %v1849_v60  ;;  %v1719_v12 = vmax.f32 %v1499_v1, 0.0  ;;  %v1721_v19 = vmax.f32 %v1622_v3, 0.0 }
 0x1be   : > { %v1502_v5 = vpop.f32.mrf.mxu0  ;;  %2973 = vmatmul.mubr.bf16.vlgmr.msra.gmra.mxu0 %v1846_v59  ;;  %v1625_v10 = vpop.f32.mrf.mxu1  ;;  %3096 = vmatmul.mubr.bf16.vlgmr.msra.gmra.mxu1 %v1848_v0 }
 0x1bf   : > { %v1503_v9 = vadd.f32 %v1502_v5, %v4550_v17  ;;  %v1726_v35 = vmax.f32 %v1501_v2, 0.0  ;;  %v1626_v63 = vadd.f32 %v1625_v10, %v4553_v14  ;;  %v1728_v13 = vmax.f32 %v1624_v4, 0.0 }
 0x1c0   : > { %v1506_v11 = vpop.f32.mrf.mxu0  ;;  %v1629_v15 = vpop.f32.mrf.mxu1 }
 0x1c1   : > { %v1727_v50 = vmax.f32 %v1503_v9, 0.0  ;;  %v1729_v16 = vmax.f32 %v1626_v63, 0.0  ;;  %v1854_v27 = vpack.c.bf16 %v1726_v35, %v1718_v49  ;;  %v1856_v43 = vpack.c.bf16 %v1728_v13, %v1720_v20 }
 0x1c2   : > { %v1508_v24 = vpop.f32.mrf.mxu0  ;;  %v1631_v23 = vpop.f32.mrf.mxu1  ;;  %v1507_v33 = vadd.f32 %v1506_v11, %v4547_v6  ;;  %v1630_v57 = vadd.f32 %v1629_v15, %v4556_v25 }
 0x1c3   : > { %v1855_v21 = vpack.c.bf16 %v1727_v50, %v1719_v12  ;;  %v1857_v28 = vpack.c.bf16 %v1729_v16, %v1721_v19  ;;  %v1509_v29 = vadd.f32 %v1508_v24, %v4550_v17  ;;  %v1632_v34 = vadd.f32 %v1631_v23, %v4553_v14 }
 0x1c4   : > { %v1510_v36 = vpop.f32.mrf.mxu0  ;;  %v1633_v31 = vpop.f32.mrf.mxu1  ;;  %v1734_v8 = vmax.f32 %v1507_v33, 0.0  ;;  %v1736_v55 = vmax.f32 %v1630_v57, 0.0 }
 0x1c5   : > { %v1511_v30 = vadd.f32 %v1510_v36, %v4547_v6  ;;  %2982 = vmatprep.mubr.bf16.mxu0 %v1855_v21  ;;  %v1634_v37 = vadd.f32 %v1633_v31, %v4556_v25  ;;  %3105 = vmatprep.mubr.bf16.mxu1 %v1857_v28  ;;  %v1735_v45 = vmax.f32 %v1509_v29, 0.0  ;;  %v1737_v52 = vmax.f32 %v1632_v34, 0.0 }
 0x1c6   : > { %v1512_v46 = vpop.f32.mrf.mxu0  ;;  %2983 = vmatmul.mubr.bf16.gmra.mxu0 %v1854_v27  ;;  %v1635_v38 = vpop.f32.mrf.mxu1  ;;  %3106 = vmatmul.mubr.bf16.gmra.mxu1 %v1856_v43 }
 0x1c7   : > { %v1513_v62 = vadd.f32 %v1512_v46, %v4550_v17  ;;  %v1742_v39 = vmax.f32 %v1511_v30, 0.0  ;;  %v1636_v40 = vadd.f32 %v1635_v38, %v4553_v14  ;;  %v1744_v56 = vmax.f32 %v1634_v37, 0.0 }
 0x1c8   : > { %v1516_v18 = vpop.f32.mrf.mxu0  ;;  %v1639_v48 = vpop.f32.mrf.mxu1 }
 0x1c9   : > { %v1743_v47 = vmax.f32 %v1513_v62, 0.0  ;;  %v1745_v53 = vmax.f32 %v1636_v40, 0.0  ;;  %v1862_v32 = vpack.c.bf16 %v1742_v39, %v1734_v8  ;;  %v1864_v61 = vpack.c.bf16 %v1744_v56, %v1736_v55 }
 0x1ca   : > { %v1518_v54 = vpop.f32.mrf.mxu0  ;;  %v1641_v26 = vpop.f32.mrf.mxu1  ;;  %v1517_v44 = vadd.f32 %v1516_v18, %v4547_v6  ;;  %v1640_v5 = vadd.f32 %v1639_v48, %v4556_v25 }
 0x1cb   : > { %v1863_v58 = vpack.c.bf16 %v1743_v47, %v1735_v45  ;;  %v1865_v59 = vpack.c.bf16 %v1745_v53, %v1737_v52  ;;  %v1519_v0 = vadd.f32 %v1518_v54, %v4550_v17  ;;  %v1642_v51 = vadd.f32 %v1641_v26, %v4553_v14 }
 0x1cc   : > { %v1520_v60 = vpop.f32.mrf.mxu0  ;;  %v1643_v2 = vpop.f32.mrf.mxu1  ;;  %v1750_v15 = vmax.f32 %v1517_v44, 0.0  ;;  %v1752_v24 = vmax.f32 %v1640_v5, 0.0 }
 0x1cd   : > { %v1521_v1 = vadd.f32 %v1520_v60, %v4547_v6  ;;  %2992 = vmatprep.mubr.bf16.mxu0 %v1863_v58  ;;  %v1644_v3 = vadd.f32 %v1643_v2, %v4556_v25  ;;  %3115 = vmatprep.mubr.bf16.mxu1 %v1865_v59  ;;  %v1751_v11 = vmax.f32 %v1519_v0, 0.0  ;;  %v1753_v49 = vmax.f32 %v1642_v51, 0.0 }
 0x1ce   : > { %v1522_v4 = vpop.f32.mrf.mxu0  ;;  %2993 = vmatmul.mubr.bf16.gmra.mxu0 %v1862_v32  ;;  %v1645_v9 = vpop.f32.mrf.mxu1  ;;  %3116 = vmatmul.mubr.bf16.gmra.mxu1 %v1864_v61 }
 0x1cf   : > { %v1523_v7 = vadd.f32 %v1522_v4, %v4550_v17  ;;  %v1758_v10 = vmax.f32 %v1521_v1, 0.0  ;;  %v1646_v35 = vadd.f32 %v1645_v9, %v4553_v14  ;;  %v1760_v12 = vmax.f32 %v1644_v3, 0.0 }
 0x1d0   : > { %v1526_v63 = vpop.f32.mrf.mxu0  ;;  %v1649_v50 = vpop.f32.mrf.mxu1 }
 0x1d1   : > { %v1759_v13 = vmax.f32 %v1523_v7, 0.0  ;;  %v1761_v19 = vmax.f32 %v1646_v35, 0.0  ;;  %v1870_v23 = vpack.c.bf16 %v1758_v10, %v1750_v15  ;;  %v1872_v36 = vpack.c.bf16 %v1760_v12, %v1752_v24 }
 0x1d2   : > { %v1528_v16 = vpop.f32.mrf.mxu0  ;;  %v1651_v21 = vpop.f32.mrf.mxu1  ;;  %v1527_v31 = vadd.f32 %v1526_v63, %v4547_v6  ;;  %v1650_v46 = vadd.f32 %v1649_v50, %v4556_v25 }
 0x1d3   : > { %v1871_v20 = vpack.c.bf16 %v1759_v13, %v1751_v11  ;;  %v1873_v27 = vpack.c.bf16 %v1761_v19, %v1753_v49  ;;  %v1529_v43 = vadd.f32 %v1528_v16, %v4550_v17  ;;  %v1652_v33 = vadd.f32 %v1651_v21, %v4553_v14 }
 0x1d4   : > { %v1530_v28 = vpop.f32.mrf.mxu0  ;;  %v1653_v30 = vpop.f32.mrf.mxu1  ;;  %v1766_v48 = vmax.f32 %v1527_v31, 0.0  ;;  %v1768_v54 = vmax.f32 %v1650_v46, 0.0 }
 0x1d5   : > { %v1531_v29 = vadd.f32 %v1530_v28, %v4547_v6  ;;  %3002 = vmatprep.mubr.bf16.mxu0 %v1871_v20  ;;  %v1654_v34 = vadd.f32 %v1653_v30, %v4556_v25  ;;  %3125 = vmatprep.mubr.bf16.mxu1 %v1873_v27  ;;  %v1767_v18 = vmax.f32 %v1529_v43, 0.0  ;;  %v1769_v8 = vmax.f32 %v1652_v33, 0.0 }
 0x1d6   : > { %v1532_v37 = vpop.f32.mrf.mxu0  ;;  %3003 = vmatmul.mubr.bf16.gmra.mxu0 %v1870_v23  ;;  %v1655_v62 = vpop.f32.mrf.mxu1  ;;  %3126 = vmatmul.mubr.bf16.gmra.mxu1 %v1872_v36 }
 0x1d7   : > { %v1533_v57 = vadd.f32 %v1532_v37, %v4550_v17  ;;  %v1774_v38 = vmax.f32 %v1531_v29, 0.0  ;;  %v1656_v39 = vadd.f32 %v1655_v62, %v4553_v14  ;;  %v1776_v45 = vmax.f32 %v1654_v34, 0.0 }
 0x1d8   : > { %v1536_v40 = vpop.f32.mrf.mxu0  ;;  %v1659_v47 = vpop.f32.mrf.mxu1 }
 0x1d9   : > { %v1775_v56 = vmax.f32 %v1533_v57, 0.0  ;;  %v1777_v52 = vmax.f32 %v1656_v39, 0.0  ;;  %v1878_v26 = vpack.c.bf16 %v1774_v38, %v1766_v48  ;;  %v1880_v60 = vpack.c.bf16 %v1776_v45, %v1768_v54 }
 0x1da   : > { %v1538_v53 = vpop.f32.mrf.mxu0  ;;  %v1661_v58 = vpop.f32.mrf.mxu1  ;;  %v1537_v2 = vadd.f32 %v1536_v40, %v4547_v6  ;;  %v1660_v4 = vadd.f32 %v1659_v47, %v4556_v25 }
 0x1db   : > { %v1879_v55 = vpack.c.bf16 %v1775_v56, %v1767_v18  ;;  %v1881_v32 = vpack.c.bf16 %v1777_v52, %v1769_v8  ;;  %v1539_v61 = vadd.f32 %v1538_v53, %v4550_v17  ;;  %v1662_v44 = vadd.f32 %v1661_v58, %v4553_v14 }
 0x1dc   : > { %v1540_v59 = vpop.f32.mrf.mxu0  ;;  %v1663_v1 = vpop.f32.mrf.mxu1  ;;  %v1782_v50 = vmax.f32 %v1537_v2, 0.0  ;;  %v1784_v16 = vmax.f32 %v1660_v4, 0.0 }
 0x1dd   : > { %v1541_v0 = vadd.f32 %v1540_v59, %v4547_v6  ;;  %3012 = vmatprep.mubr.bf16.mxu0 %v1879_v55  ;;  %v1664_v51 = vadd.f32 %v1663_v1, %v4556_v25  ;;  %3135 = vmatprep.mubr.bf16.mxu1 %v1881_v32  ;;  %v1783_v63 = vmax.f32 %v1539_v61, 0.0  ;;  %v1785_v15 = vmax.f32 %v1662_v44, 0.0 }
 0x1de   : > { %v1542_v3 = vpop.f32.mrf.mxu0  ;;  %3013 = vmatmul.mubr.bf16.gmra.mxu0 %v1878_v26  ;;  %v1665_v7 = vpop.f32.mrf.mxu1  ;;  %3136 = vmatmul.mubr.bf16.gmra.mxu1 %v1880_v60 }
 0x1df   : > { %v1543_v5 = vadd.f32 %v1542_v3, %v4550_v17  ;;  %v1790_v9 = vmax.f32 %v1541_v0, 0.0  ;;  %v1666_v10 = vadd.f32 %v1665_v7, %v4553_v14  ;;  %v1792_v11 = vmax.f32 %v1664_v51, 0.0 }
 0x1e0   : > { %v1546_v35 = vpop.f32.mrf.mxu0  ;;  %v1669_v13 = vpop.f32.mrf.mxu1 }
 0x1e1   : > { %v1791_v12 = vmax.f32 %v1543_v5, 0.0  ;;  %v1793_v49 = vmax.f32 %v1666_v10, 0.0  ;;  %v1886_v21 = vpack.c.bf16 %v1790_v9, %v1782_v50  ;;  %v1888_v28 = vpack.c.bf16 %v1792_v11, %v1784_v16 }
 0x1e2   : > { %v1548_v19 = vpop.f32.mrf.mxu0  ;;  %v1671_v20 = vpop.f32.mrf.mxu1  ;;  %v1547_v30 = vadd.f32 %v1546_v35, %v4547_v6  ;;  %v1670_v37 = vadd.f32 %v1669_v13, %v4556_v25 }
 0x1e3   : > { %v1887_v24 = vpack.c.bf16 %v1791_v12, %v1783_v63  ;;  %v1889_v23 = vpack.c.bf16 %v1793_v49, %v1785_v15  ;;  %v1549_v36 = vadd.f32 %v1548_v19, %v4550_v17  ;;  %v1672_v31 = vadd.f32 %v1671_v20, %v4553_v14 }
 0x1e4   : > { %v1550_v27 = vpop.f32.mrf.mxu0  ;;  %v1673_v29 = vpop.f32.mrf.mxu1  ;;  %v1798_v47 = vmax.f32 %v1547_v30, 0.0  ;;  %v1800_v53 = vmax.f32 %v1670_v37, 0.0 }
 0x1e5   : > { %v1551_v43 = vadd.f32 %v1550_v27, %v4547_v6  ;;  %3022 = vmatprep.mubr.bf16.mxu0 %v1887_v24  ;;  %v1674_v33 = vadd.f32 %v1673_v29, %v4556_v25  ;;  %3145 = vmatprep.mubr.bf16.mxu1 %v1889_v23  ;;  %v1799_v40 = vmax.f32 %v1549_v36, 0.0  ;;  %v1801_v48 = vmax.f32 %v1672_v31, 0.0 }
 0x1e6   : > { %v1552_v34 = vpop.f32.mrf.mxu0  ;;  %3023 = vmatmul.mubr.bf16.gmra.mxu0 %v1886_v21  ;;  %v1675_v57 = vpop.f32.mrf.mxu1  ;;  %3146 = vmatmul.mubr.bf16.gmra.mxu1 %v1888_v28 }
 0x1e7   : > { %v1553_v46 = vadd.f32 %v1552_v34, %v4550_v17  ;;  %v1806_v62 = vmax.f32 %v1551_v43, 0.0  ;;  %v1676_v38 = vadd.f32 %v1675_v57, %v4553_v14  ;;  %v1808_v18 = vmax.f32 %v1674_v33, 0.0 }
 0x1e8   : > { %v1556_v39 = vpop.f32.mrf.mxu0  ;;  %v1679_v56 = vpop.f32.mrf.mxu1 }
 0x1e9   : > { %v1807_v45 = vmax.f32 %v1553_v46, 0.0  ;;  %v1809_v8 = vmax.f32 %v1676_v38, 0.0  ;;  %v1894_v58 = vpack.c.bf16 %v1806_v62, %v1798_v47  ;;  %v1896_v59 = vpack.c.bf16 %v1808_v18, %v1800_v53 }
 0x1ea   : > { %v1558_v52 = vpop.f32.mrf.mxu0  ;;  %v1681_v55 = vpop.f32.mrf.mxu1  ;;  %v1557_v1 = vadd.f32 %v1556_v39, %v4547_v6  ;;  %v1680_v3 = vadd.f32 %v1679_v56, %v4556_v25 }
 0x1eb   : > { %v1895_v54 = vpack.c.bf16 %v1807_v45, %v1799_v40  ;;  %v1897_v26 = vpack.c.bf16 %v1809_v8, %v1801_v48  ;;  %v1559_v60 = vadd.f32 %v1558_v52, %v4550_v17  ;;  %v1682_v2 = vadd.f32 %v1681_v55, %v4553_v14 }
 0x1ec   : > { %v1560_v32 = vpop.f32.mrf.mxu0  ;;  %v1683_v0 = vpop.f32.mrf.mxu1  ;;  %v1814_v13 = vmax.f32 %v1557_v1, 0.0  ;;  %v1816_v19 = vmax.f32 %v1680_v3, 0.0 }
 0x1ed   : > { %v1561_v61 = vadd.f32 %v1560_v32, %v4547_v6  ;;  %3032 = vmatprep.mubr.bf16.mxu0 %v1895_v54  ;;  %v1684_v44 = vadd.f32 %v1683_v0, %v4556_v25  ;;  %3155 = vmatprep.mubr.bf16.mxu1 %v1897_v26  ;;  %v1815_v35 = vmax.f32 %v1559_v60, 0.0  ;;  %v1817_v50 = vmax.f32 %v1682_v2, 0.0 }
 0x1ee   : > { %v1562_v51 = vpop.f32.mrf.mxu0  ;;  %3033 = vmatmul.mubr.bf16.gmra.mxu0 %v1894_v58  ;;  %v1685_v5 = vpop.f32.mrf.mxu1  ;;  %3156 = vmatmul.mubr.bf16.gmra.mxu1 %v1896_v59 }
 0x1ef   : > { %v1563_v4 = vadd.f32 %v1562_v51, %v4550_v17  ;;  %v1822_v7 = vmax.f32 %v1561_v61, 0.0  ;;  %v1686_v9 = vadd.f32 %v1685_v5, %v4553_v14  ;;  %v1824_v63 = vmax.f32 %v1684_v44, 0.0 }
 0x1f0   : > { %v1566_v10 = vpop.f32.mrf.mxu0  ;;  %v1689_v12 = vpop.f32.mrf.mxu1 }
 0x1f1   : > { %v1823_v11 = vmax.f32 %v1563_v4, 0.0  ;;  %v1825_v15 = vmax.f32 %v1686_v9, 0.0  ;;  %v1902_v20 = vpack.c.bf16 %v1822_v7, %v1814_v13  ;;  %v1904_v27 = vpack.c.bf16 %v1824_v63, %v1816_v19 }
 0x1f2   : > { %v1568_v49 = vpop.f32.mrf.mxu0  ;;  %v1691_v24 = vpop.f32.mrf.mxu1  ;;  %v1567_v29 = vadd.f32 %v1566_v10, %v4547_v6  ;;  %v1690_v34 = vadd.f32 %v1689_v12, %v4556_v25 }
 0x1f3   : > { %v1903_v16 = vpack.c.bf16 %v1823_v11, %v1815_v35  ;;  %v1905_v21 = vpack.c.bf16 %v1825_v15, %v1817_v50  ;;  %v1569_v28 = vadd.f32 %v1568_v49, %v4550_v17  ;;  %v1692_v30 = vadd.f32 %v1691_v24, %v4553_v14 }
 0x1f4   : > { %v1570_v23 = vpop.f32.mrf.mxu0  ;;  %v1693_v43 = vpop.f32.mrf.mxu1  ;;  %v1832_v56 = vmax.f32 %v1690_v34, 0.0 }
 0x1f5   : > { %v1571_v36 = vadd.f32 %v1570_v23, %v4547_v6  ;;  %3042 = vmatprep.mubr.bf16.mxu0 %v1903_v16  ;;  %v1694_v31 = vadd.f32 %v1693_v43, %v4556_v25  ;;  %3165 = vmatprep.mubr.bf16.mxu1 %v1905_v21  ;;  %v1831_v38 = vmax.f32 %v1569_v28, 0.0  ;;  %v1830_v6 = vmax.f32 %v1567_v29, 0.0 }
 0x1f6   : > { %v1572_v33 = vpop.f32.mrf.mxu0  ;;  %3043 = vmatmul.mubr.bf16.gmra.mxu0 %v1902_v20  ;;  %v1695_v46 = vpop.f32.mrf.mxu1  ;;  %3166 = vmatmul.mubr.bf16.gmra.mxu1 %v1904_v27  ;;  %v1833_v18 = vmax.f32 %v1692_v30, 0.0 }
 0x1f7   : > { %v1573_v37 = vadd.f32 %v1572_v33, %v4550_v17  ;;  %v1838_v57 = vmax.f32 %v1571_v36, 0.0  ;;  %v1696_v62 = vadd.f32 %v1695_v46, %v4553_v14  ;;  %v1840_v39 = vmax.f32 %v1694_v31, 0.0  ;;  %v2042_v17 = vld [vmem:[%s4878_s4] sm:$0x3] }
 0x1f8   : > { %v4635_v14 = vrot.slane %v2042_v17, %v438_v42  ;;  %v4639_v25 = vrot.slane %v2042_v17, %v442_v22 }
 0x1f9   : > { %v1839_v40 = vmax.f32 %v1573_v37, 0.0  ;;  %v1841_v45 = vmax.f32 %v1696_v62, 0.0  ;;  %v1910_v48 = vpack.c.bf16 %v1838_v57, %v1830_v6  ;;  %v1912_v52 = vpack.c.bf16 %v1840_v39, %v1832_v56 }
 0x1fb   : > { %v1911_v47 = vpack.c.bf16 %v1839_v40, %v1831_v38  ;;  %v1913_v8 = vpack.c.bf16 %v1841_v45, %v1833_v18 }
 0x1fd   : > { %3052 = vmatprep.mubr.bf16.mxu0 %v1911_v47  ;;  %3175 = vmatprep.mubr.bf16.mxu1 %v1913_v8 }
 0x1fe   : > { %3053 = vmatmul.mubr.bf16.gmra.mxu0 %v1910_v48  ;;  %3176 = vmatmul.mubr.bf16.gmra.mxu1 %v1912_v52 }
 0x236   : > { %v2728_v53 = vpop.f32.mrf.mxu0  ;;  %v2851_v55 = vpop.f32.mrf.mxu1 }
 0x237   : > { %v2729_v54 = vadd.f32 %v2728_v53, %v4635_v14 }
 0x238   : > { %v2730_v58 = vpop.f32.mrf.mxu0  ;;  %v2853_v59 = vpop.f32.mrf.mxu1 }
 0x239   : > { %v4642_v26 = vadd.f32 %v2851_v55, %v2729_v54  ;;  %v2731_v32 = vadd.f32 %v2730_v58, %v4639_v25 }
 0x23a   : > { %v2732_v60 = vpop.f32.mrf.mxu0  ;;  %v2855_v0 = vpop.f32.mrf.mxu1 }
 0x23b   : > { %v4645_v61 = vadd.f32 %v2853_v59, %v2731_v32  ;;  %v2733_v42 = vadd.f32 %v2732_v60, %v4635_v14 }
 0x23c   : > { %v2734_v1 = vpop.f32.mrf.mxu0  ;;  %v2857_v2 = vpop.f32.mrf.mxu1 }
 0x23d   : > { %v4648_v41 = vadd.f32 %v2855_v0, %v2733_v42  ;;  %v2735_v22 = vadd.f32 %v2734_v1, %v4639_v25 }
 0x23e   : > { %v2738_v44 = vpop.f32.mrf.mxu0  ;;  %v2861_v4 = vpop.f32.mrf.mxu1 }
 0x23f   : > { %v4651_v51 = vadd.f32 %v2857_v2, %v2735_v22  ;;  %v2739_v3 = vadd.f32 %v2738_v44, %v4635_v14 }
 0x240   : > { %v2740_v5 = vpop.f32.mrf.mxu0  ;;  %v2863_v10 = vpop.f32.mrf.mxu1 }
 0x241   : > { %v4654_v7 = vadd.f32 %v2861_v4, %v2739_v3  ;;  %v2741_v9 = vadd.f32 %v2740_v5, %v4639_v25 }
 0x242   : > { %v2742_v35 = vpop.f32.mrf.mxu0  ;;  %v2865_v12 = vpop.f32.mrf.mxu1 }
 0x243   : > { %v4657_v63 = vadd.f32 %v2863_v10, %v2741_v9  ;;  %v2743_v11 = vadd.f32 %v2742_v35, %v4635_v14 }
 0x244   : > { %v2744_v13 = vpop.f32.mrf.mxu0  ;;  %v2867_v49 = vpop.f32.mrf.mxu1 }
 0x245   : > { %v4660_v50 = vadd.f32 %v2865_v12, %v2743_v11  ;;  %v2745_v15 = vadd.f32 %v2744_v13, %v4639_v25 }
 0x246   : > { %v2748_v19 = vpop.f32.mrf.mxu0  ;;  %v2871_v20 = vpop.f32.mrf.mxu1 }
 0x247   : > { %v4663_v16 = vadd.f32 %v2867_v49, %v2745_v15  ;;  %v2749_v24 = vadd.f32 %v2748_v19, %v4635_v14 }
 0x248   : > { %v2750_v21 = vpop.f32.mrf.mxu0  ;;  %v2873_v28 = vpop.f32.mrf.mxu1 }
 0x249   : > { %v4666_v23 = vadd.f32 %v2871_v20, %v2749_v24  ;;  %v2751_v27 = vadd.f32 %v2750_v21, %v4639_v25 }
 0x24a   : > { %v2752_v36 = vpop.f32.mrf.mxu0  ;;  %v2875_v30 = vpop.f32.mrf.mxu1 }
 0x24b   : > { %v4669_v43 = vadd.f32 %v2873_v28, %v2751_v27  ;;  %v2753_v29 = vadd.f32 %v2752_v36, %v4635_v14 }
 0x24c   : > { %v2754_v31 = vpop.f32.mrf.mxu0  ;;  %v2877_v37 = vpop.f32.mrf.mxu1 }
 0x24d   : > { %v4672_v33 = vadd.f32 %v2875_v30, %v2753_v29  ;;  %v2755_v34 = vadd.f32 %v2754_v31, %v4639_v25 }
 0x24e   : > { %v2758_v46 = vpop.f32.mrf.mxu0  ;;  %v2881_v38 = vpop.f32.mrf.mxu1 }
 0x24f   : > { %v4675_v57 = vadd.f32 %v2877_v37, %v2755_v34  ;;  %v2759_v62 = vadd.f32 %v2758_v46, %v4635_v14 }
 0x250   : > { %v2760_v39 = vpop.f32.mrf.mxu0  ;;  %v2883_v18 = vpop.f32.mrf.mxu1 }
 0x251   : > { %v4678_v40 = vadd.f32 %v2881_v38, %v2759_v62  ;;  %v2761_v6 = vadd.f32 %v2760_v39, %v4639_v25 }
 0x252   : > { %v2762_v45 = vpop.f32.mrf.mxu0  ;;  %v2885_v48 = vpop.f32.mrf.mxu1 }
 0x253   : > { %v4681_v56 = vadd.f32 %v2883_v18, %v2761_v6  ;;  %v2763_v47 = vadd.f32 %v2762_v45, %v4635_v14 }
 0x254   : > { %v2764_v8 = vpop.f32.mrf.mxu0  ;;  %v2887_v53 = vpop.f32.mrf.mxu1 }
 0x255   : > { %v4684_v52 = vadd.f32 %v2885_v48, %v2763_v47  ;;  %v2765_v17 = vadd.f32 %v2764_v8, %v4639_v25 }
 0x256   : > { %v2768_v54 = vpop.f32.mrf.mxu0  ;;  %v2891_v32 = vpop.f32.mrf.mxu1 }
 0x257   : > { %v4687_v55 = vadd.f32 %v2887_v53, %v2765_v17  ;;  %v2769_v58 = vadd.f32 %v2768_v54, %v4635_v14 }
 0x258   : > { %v2770_v59 = vpop.f32.mrf.mxu0  ;;  %v2893_v0 = vpop.f32.mrf.mxu1 }
 0x259   : > { %v4690_v60 = vadd.f32 %v2891_v32, %v2769_v58  ;;  %v2771_v42 = vadd.f32 %v2770_v59, %v4639_v25 }
 0x25a   : > { %v2772_v1 = vpop.f32.mrf.mxu0  ;;  %v2895_v44 = vpop.f32.mrf.mxu1 }
 0x25b   : > { %v4693_v22 = vadd.f32 %v2893_v0, %v2771_v42  ;;  %v2773_v2 = vadd.f32 %v2772_v1, %v4635_v14 }
 0x25c   : > { %v2774_v3 = vpop.f32.mrf.mxu0  ;;  %v2897_v9 = vpop.f32.mrf.mxu1 }
 0x25d   : > { %v4696_v4 = vadd.f32 %v2895_v44, %v2773_v2  ;;  %v2775_v5 = vadd.f32 %v2774_v3, %v4639_v25 }
 0x25e   : > { %v2778_v10 = vpop.f32.mrf.mxu0  ;;  %v2901_v12 = vpop.f32.mrf.mxu1 }
 0x25f   : > { %v4699_v35 = vadd.f32 %v2897_v9, %v2775_v5  ;;  %v2779_v11 = vadd.f32 %v2778_v10, %v4635_v14 }
 0x260   : > { %v2780_v13 = vpop.f32.mrf.mxu0  ;;  %v2903_v19 = vpop.f32.mrf.mxu1 }
 0x261   : > { %v4702_v15 = vadd.f32 %v2901_v12, %v2779_v11  ;;  %v2781_v49 = vadd.f32 %v2780_v13, %v4639_v25 }
 0x262   : > { %v2782_v24 = vpop.f32.mrf.mxu0  ;;  %v2905_v27 = vpop.f32.mrf.mxu1 }
 0x263   : > { %v4705_v20 = vadd.f32 %v2903_v19, %v2781_v49  ;;  %v2783_v21 = vadd.f32 %v2782_v24, %v4635_v14 }
 0x264   : > { %v2784_v28 = vpop.f32.mrf.mxu0  ;;  %v2907_v30 = vpop.f32.mrf.mxu1 }
 0x265   : > { %v4708_v36 = vadd.f32 %v2905_v27, %v2783_v21  ;;  %v2785_v29 = vadd.f32 %v2784_v28, %v4639_v25 }
 0x266   : > { %v2788_v31 = vpop.f32.mrf.mxu0  ;;  %v2911_v46 = vpop.f32.mrf.mxu1 }
 0x267   : > { %v4711_v34 = vadd.f32 %v2907_v30, %v2785_v29  ;;  %v2789_v37 = vadd.f32 %v2788_v31, %v4635_v14 }
 0x268   : > { %v2790_v62 = vpop.f32.mrf.mxu0  ;;  %v2913_v6 = vpop.f32.mrf.mxu1 }
 0x269   : > { %v4714_v38 = vadd.f32 %v2911_v46, %v2789_v37  ;;  %v2791_v39 = vadd.f32 %v2790_v62, %v4639_v25 }
 0x26a   : > { %v2792_v18 = vpop.f32.mrf.mxu0  ;;  %v2915_v48 = vpop.f32.mrf.mxu1 }
 0x26b   : > { %v4717_v45 = vadd.f32 %v2913_v6, %v2791_v39  ;;  %v2793_v47 = vadd.f32 %v2792_v18, %v4635_v14 }
 0x26c   : > { %v2794_v8 = vpop.f32.mrf.mxu0  ;;  %v2917_v54 = vpop.f32.mrf.mxu1 }
 0x26d   : > { %v4720_v17 = vadd.f32 %v2915_v48, %v2793_v47  ;;  %v2795_v53 = vadd.f32 %v2794_v8, %v4639_v25 }
 0x26e   : > { %v2798_v58 = vpop.f32.mrf.mxu0  ;;  %v2921_v42 = vpop.f32.mrf.mxu1 }
 0x26f   : > { %v4723_v32 = vadd.f32 %v2917_v54, %v2795_v53  ;;  %v2799_v59 = vadd.f32 %v2798_v58, %v4635_v14 }
 0x270   : > { %v2800_v0 = vpop.f32.mrf.mxu0  ;;  %v2923_v44 = vpop.f32.mrf.mxu1 }
 0x271   : > { %v4726_v1 = vadd.f32 %v2921_v42, %v2799_v59  ;;  %v2801_v2 = vadd.f32 %v2800_v0, %v4639_v25 }
 0x272   : > { %v2802_v3 = vpop.f32.mrf.mxu0  ;;  %v2925_v10 = vpop.f32.mrf.mxu1 }
 0x273   : > { %v4729_v5 = vadd.f32 %v2923_v44, %v2801_v2  ;;  %v2803_v9 = vadd.f32 %v2802_v3, %v4635_v14 }
 0x274   : > { %v2804_v11 = vpop.f32.mrf.mxu0  ;;  %v2927_v49 = vpop.f32.mrf.mxu1 }
 0x275   : > { %v4732_v12 = vadd.f32 %v2925_v10, %v2803_v9  ;;  %v2805_v13 = vadd.f32 %v2804_v11, %v4639_v25 }
 0x276   : > { %v2808_v19 = vpop.f32.mrf.mxu0  ;;  %v2931_v27 = vpop.f32.mrf.mxu1 }
 0x277   : > { %v4735_v24 = vadd.f32 %v2927_v49, %v2805_v13  ;;  %v2809_v21 = vadd.f32 %v2808_v19, %v4635_v14 }
 0x278   : > { %v2810_v28 = vpop.f32.mrf.mxu0  ;;  %v2933_v31 = vpop.f32.mrf.mxu1 }
 0x279   : > { %v4738_v29 = vadd.f32 %v2931_v27, %v2809_v21  ;;  %v2811_v30 = vadd.f32 %v2810_v28, %v4639_v25 }
 0x27a   : > { %v2812_v37 = vpop.f32.mrf.mxu0  ;;  %v2935_v39 = vpop.f32.mrf.mxu1 }
 0x27b   : > { %v4741_v46 = vadd.f32 %v2933_v31, %v2811_v30  ;;  %v2813_v62 = vadd.f32 %v2812_v37, %v4635_v14 }
 0x27c   : > { %v2814_v6 = vpop.f32.mrf.mxu0  ;;  %v2937_v48 = vpop.f32.mrf.mxu1 }
 0x27d   : > { %v4745_v18 = vadd.f32 %v2935_v39, %v2813_v62  ;;  %v2815_v47 = vadd.f32 %v2814_v6, %v4639_v25 }
 0x27e   : > { %v2974_v8 = vpop.f32.mrf.mxu0  ;;  %v3097_v58 = vpop.f32.mrf.mxu1 }
 0x27f   : > { %v4748_v53 = vadd.f32 %v2937_v48, %v2815_v47  ;;  %v2975_v54 = vadd.f32 %v2974_v8, %v4642_v26 }
 0x280   : > { %v2976_v59 = vpop.f32.mrf.mxu0  ;;  %v3099_v2 = vpop.f32.mrf.mxu1 }
 0x281   : > { %v3098_v42 = vadd.f32 %v3097_v58, %v2975_v54  ;;  %v2977_v0 = vadd.f32 %v2976_v59, %v4645_v61 }
 0x282   : > { %v2978_v14 = vpop.f32.mrf.mxu0  ;;  %v3101_v3 = vpop.f32.mrf.mxu1 }
 0x283   : > { %3186 = vst [vmem:[%s4752_s13] sm:$0xff] %v3098_v42  ;;  %v3100_v25 = vadd.f32 %v3099_v2, %v2977_v0  ;;  %v2979_v44 = vadd.f32 %v2978_v14, %v4648_v41 }
 0x284   : > { %v2980_v9 = vpop.f32.mrf.mxu0  ;;  %v3103_v61 = vpop.f32.mrf.mxu1 }
 0x285   : > { %3187 = vst [vmem:[%s4752_s13 + $0x8] sm:$0xff] %v3100_v25  ;;  %v3102_v26 = vadd.f32 %v3101_v3, %v2979_v44  ;;  %v2981_v10 = vadd.f32 %v2980_v9, %v4651_v51 }
 0x286   : > { %v2984_v11 = vpop.f32.mrf.mxu0  ;;  %v3107_v19 = vpop.f32.mrf.mxu1 }
 0x287   : > { %3188 = vst [vmem:[%s4752_s13 + $0x10] sm:$0xff] %v3102_v26  ;;  %v3104_v13 = vadd.f32 %v3103_v61, %v2981_v10  ;;  %v2985_v49 = vadd.f32 %v2984_v11, %v4654_v7 }
 0x288   : > { %v2986_v21 = vpop.f32.mrf.mxu0  ;;  %v3109_v28 = vpop.f32.mrf.mxu1 }
 0x289   : > { %3189 = vst [vmem:[%s4752_s13 + $0x18] sm:$0xff] %v3104_v13  ;;  %v3108_v27 = vadd.f32 %v3107_v19, %v2985_v49  ;;  %v2987_v41 = vadd.f32 %v2986_v21, %v4657_v63 }
 0x28a   : > { %v2988_v30 = vpop.f32.mrf.mxu0  ;;  %v3111_v37 = vpop.f32.mrf.mxu1 }
 0x28b   : > { %3190 = vst [vmem:[%s4752_s13 + $0x20] sm:$0xff] %v3108_v27  ;;  %v3110_v31 = vadd.f32 %v3109_v28, %v2987_v41  ;;  %v2989_v51 = vadd.f32 %v2988_v30, %v4660_v50 }
 0x28c   : > { %v2990_v62 = vpop.f32.mrf.mxu0  ;;  %v3113_v6 = vpop.f32.mrf.mxu1 }
 0x28d   : > { %3191 = vst [vmem:[%s4752_s13 + $0x28] sm:$0xff] %v3110_v31  ;;  %v3112_v39 = vadd.f32 %v3111_v37, %v2989_v51  ;;  %v2991_v7 = vadd.f32 %v2990_v62, %v4663_v16 }
 0x28e   : > { %v2994_v47 = vpop.f32.mrf.mxu0  ;;  %v3117_v8 = vpop.f32.mrf.mxu1 }
 0x28f   : > { %3192 = vst [vmem:[%s4752_s13 + $0x30] sm:$0xff] %v3112_v39  ;;  %v3114_v48 = vadd.f32 %v3113_v6, %v2991_v7  ;;  %v2995_v63 = vadd.f32 %v2994_v47, %v4666_v23 }
 0x290   : > { %v2996_v54 = vpop.f32.mrf.mxu0  ;;  %v3119_v59 = vpop.f32.mrf.mxu1 }
 0x291   : > { %3193 = vst [vmem:[%s4752_s13 + $0x38] sm:$0xff] %v3114_v48  ;;  %v3118_v58 = vadd.f32 %v3117_v8, %v2995_v63  ;;  %v2997_v50 = vadd.f32 %v2996_v54, %v4669_v43 }
 0x292   : > { %v2998_v42 = vpop.f32.mrf.mxu0  ;;  %v3121_v2 = vpop.f32.mrf.mxu1 }
 0x293   : > { %3194 = vst [vmem:[%s4752_s13 + $0x40] sm:$0xff] %v3118_v58  ;;  %v3120_v0 = vadd.f32 %v3119_v59, %v2997_v50  ;;  %v2999_v16 = vadd.f32 %v2998_v42, %v4672_v33 }
 0x294   : > { %v3000_v14 = vpop.f32.mrf.mxu0  ;;  %v3123_v44 = vpop.f32.mrf.mxu1 }
 0x295   : > { %3195 = vst [vmem:[%s4752_s13 + $0x48] sm:$0xff] %v3120_v0  ;;  %v3122_v25 = vadd.f32 %v3121_v2, %v2999_v16  ;;  %v3001_v23 = vadd.f32 %v3000_v14, %v4675_v57 }
 0x296   : > { %v3004_v3 = vpop.f32.mrf.mxu0  ;;  %v3127_v26 = vpop.f32.mrf.mxu1 }
 0x297   : > { %3196 = vst [vmem:[%s4752_s13 + $0x50] sm:$0xff] %v3122_v25  ;;  %v3124_v9 = vadd.f32 %v3123_v44, %v3001_v23  ;;  %v3005_v43 = vadd.f32 %v3004_v3, %v4678_v40 }
 0x298   : > { %v3006_v10 = vpop.f32.mrf.mxu0  ;;  %v3129_v11 = vpop.f32.mrf.mxu1 }
 0x299   : > { %3197 = vst [vmem:[%s4752_s13 + $0x58] sm:$0xff] %v3124_v9  ;;  %v3128_v61 = vadd.f32 %v3127_v26, %v3005_v43  ;;  %v3007_v33 = vadd.f32 %v3006_v10, %v4681_v56 }
 0x29a   : > { %v3008_v13 = vpop.f32.mrf.mxu0  ;;  %v3131_v19 = vpop.f32.mrf.mxu1 }
 0x29b   : > { %3198 = vst [vmem:[%s4752_s13 + $0x60] sm:$0xff] %v3128_v61  ;;  %v3130_v49 = vadd.f32 %v3129_v11, %v3007_v33  ;;  %v3009_v57 = vadd.f32 %v3008_v13, %v4684_v52 }
 0x29c   : > { %v3010_v21 = vpop.f32.mrf.mxu0  ;;  %v3133_v41 = vpop.f32.mrf.mxu1 }
 0x29d   : > { %3199 = vst [vmem:[%s4752_s13 + $0x68] sm:$0xff] %v3130_v49  ;;  %v3132_v27 = vadd.f32 %v3131_v19, %v3009_v57  ;;  %v3011_v40 = vadd.f32 %v3010_v21, %v4687_v55 }
 0x29e   : > { %v3014_v28 = vpop.f32.mrf.mxu0  ;;  %v3137_v31 = vpop.f32.mrf.mxu1 }
 0x29f   : > { %3200 = vst [vmem:[%s4752_s13 + $0x70] sm:$0xff] %v3132_v27  ;;  %v3134_v30 = vadd.f32 %v3133_v41, %v3011_v40  ;;  %v3015_v56 = vadd.f32 %v3014_v28, %v4690_v60 }
 0x2a0   : > { %v3016_v51 = vpop.f32.mrf.mxu0  ;;  %v3139_v62 = vpop.f32.mrf.mxu1 }
 0x2a1   : > { %3201 = vst [vmem:[%s4752_s13 + $0x78] sm:$0xff] %v3134_v30  ;;  %v3138_v37 = vadd.f32 %v3137_v31, %v3015_v56  ;;  %v3017_v52 = vadd.f32 %v3016_v51, %v4693_v22 }
 0x2a2   : > { %v3018_v39 = vpop.f32.mrf.mxu0  ;;  %v3141_v6 = vpop.f32.mrf.mxu1 }
 0x2a3   : > { %3202 = vst [vmem:[%s4752_s13 + $0x80] sm:$0xff] %v3138_v37  ;;  %v3140_v7 = vadd.f32 %v3139_v62, %v3017_v52  ;;  %v3019_v55 = vadd.f32 %v3018_v39, %v4696_v4 }
 0x2a4   : > { %v3020_v47 = vpop.f32.mrf.mxu0  ;;  %v3143_v63 = vpop.f32.mrf.mxu1 }
 0x2a5   : > { %3203 = vst [vmem:[%s4752_s13 + $0x88] sm:$0xff] %v3140_v7  ;;  %v3142_v48 = vadd.f32 %v3141_v6, %v3019_v55  ;;  %v3021_v60 = vadd.f32 %v3020_v47, %v4699_v35 }
 0x2a6   : > { %v3024_v8 = vpop.f32.mrf.mxu0  ;;  %v3147_v58 = vpop.f32.mrf.mxu1 }
 0x2a7   : > { %3204 = vst [vmem:[%s4752_s13 + $0x90] sm:$0xff] %v3142_v48  ;;  %v3144_v54 = vadd.f32 %v3143_v63, %v3021_v60  ;;  %v3025_v22 = vadd.f32 %v3024_v8, %v4702_v15 }
 0x2a8   : > { %v3026_v50 = vpop.f32.mrf.mxu0  ;;  %v3149_v42 = vpop.f32.mrf.mxu1 }
 0x2a9   : > { %3205 = vst [vmem:[%s4752_s13 + $0x98] sm:$0xff] %v3144_v54  ;;  %v3148_v59 = vadd.f32 %v3147_v58, %v3025_v22  ;;  %v3027_v4 = vadd.f32 %v3026_v50, %v4705_v20 }
 0x2aa   : > { %v3028_v0 = vpop.f32.mrf.mxu0  ;;  %v3151_v2 = vpop.f32.mrf.mxu1 }
 0x2ab   : > { %3206 = vst [vmem:[%s4752_s13 + $0xa0] sm:$0xff] %v3148_v59  ;;  %v3150_v16 = vadd.f32 %v3149_v42, %v3027_v4  ;;  %v3029_v35 = vadd.f32 %v3028_v0, %v4708_v36 }
 0x2ac   : > { %v3030_v14 = vpop.f32.mrf.mxu0  ;;  %v3153_v23 = vpop.f32.mrf.mxu1 }
 0x2ad   : > { %3207 = vst [vmem:[%s4752_s13 + $0xa8] sm:$0xff] %v3150_v16  ;;  %v3152_v25 = vadd.f32 %v3151_v2, %v3029_v35  ;;  %v3031_v15 = vadd.f32 %v3030_v14, %v4711_v34 }
 0x2ae   : > { %v3034_v44 = vpop.f32.mrf.mxu0  ;;  %v3157_v9 = vpop.f32.mrf.mxu1 }
 0x2af   : > { %3208 = vst [vmem:[%s4752_s13 + $0xb0] sm:$0xff] %v3152_v25  ;;  %v3154_v3 = vadd.f32 %v3153_v23, %v3031_v15  ;;  %v3035_v20 = vadd.f32 %v3034_v44, %v4714_v38 }
 0x2b0   : > { %v3036_v43 = vpop.f32.mrf.mxu0  ;;  %v3159_v10 = vpop.f32.mrf.mxu1 }
 0x2b1   : > { %3209 = vst [vmem:[%s4752_s13 + $0xb8] sm:$0xff] %v3154_v3  ;;  %v3158_v26 = vadd.f32 %v3157_v9, %v3035_v20  ;;  %v3037_v36 = vadd.f32 %v3036_v43, %v4717_v45 }
 0x2b2   : > { %v3038_v61 = vpop.f32.mrf.mxu0  ;;  %v3161_v11 = vpop.f32.mrf.mxu1 }
 0x2b3   : > { %3210 = vst [vmem:[%s4752_s13 + $0xc0] sm:$0xff] %v3158_v26  ;;  %v3160_v33 = vadd.f32 %v3159_v10, %v3037_v36  ;;  %v3039_v34 = vadd.f32 %v3038_v61, %v4720_v17 }
 0x2b4   : > { %v3040_v13 = vpop.f32.mrf.mxu0  ;;  %v3163_v57 = vpop.f32.mrf.mxu1 }
 0x2b5   : > { %3211 = vst [vmem:[%s4752_s13 + $0xc8] sm:$0xff] %v3160_v33  ;;  %v3162_v49 = vadd.f32 %v3161_v11, %v3039_v34  ;;  %v3041_v38 = vadd.f32 %v3040_v13, %v4723_v32 }
 0x2b6   : > { %v3044_v19 = vpop.f32.mrf.mxu0  ;;  %v3167_v27 = vpop.f32.mrf.mxu1 }
 0x2b7   : > { %3212 = vst [vmem:[%s4752_s13 + $0xd0] sm:$0xff] %v3162_v49  ;;  %v3164_v21 = vadd.f32 %v3163_v57, %v3041_v38  ;;  %v3045_v45 = vadd.f32 %v3044_v19, %v4726_v1 }
 0x2b8   : > { %v3046_v40 = vpop.f32.mrf.mxu0  ;;  %v3169_v28 = vpop.f32.mrf.mxu1 }
 0x2b9   : > { %3213 = vst [vmem:[%s4752_s13 + $0xd8] sm:$0xff] %v3164_v21  ;;  %v3168_v41 = vadd.f32 %v3167_v27, %v3045_v45  ;;  %v3047_v17 = vadd.f32 %v3046_v40, %v4729_v5 }
 0x2ba   : > { %v3048_v30 = vpop.f32.mrf.mxu0  ;;  %v3171_v31 = vpop.f32.mrf.mxu1 }
 0x2bb   : > { %3214 = vst [vmem:[%s4752_s13 + $0xe0] sm:$0xff] %v3168_v41  ;;  %v3170_v56 = vadd.f32 %v3169_v28, %v3047_v17  ;;  %v3049_v32 = vadd.f32 %v3048_v30, %v4732_v12 }
 0x2bc   : > { %v3050_v51 = vpop.f32.mrf.mxu0  ;;  %v3173_v52 = vpop.f32.mrf.mxu1 }
 0x2bd   : > { %3215 = vst [vmem:[%s4752_s13 + $0xe8] sm:$0xff] %v3170_v56  ;;  %v3172_v1 = vadd.f32 %v3171_v31, %v3049_v32  ;;  %v3051_v37 = vadd.f32 %v3050_v51, %v4735_v24 }
 0x2be   : > { %v3054_v62 = vpop.f32.mrf.mxu0  ;;  %v3177_v7 = vpop.f32.mrf.mxu1 }
 0x2bf   : > { %3216 = vst [vmem:[%s4752_s13 + $0xf0] sm:$0xff] %v3172_v1  ;;  %v3174_v5 = vadd.f32 %v3173_v52, %v3051_v37  ;;  %v3055_v39 = vadd.f32 %v3054_v62, %v4738_v29 }
 0x2c0   : > { %v3056_v55 = vpop.f32.mrf.mxu0  ;;  %v3179_v47 = vpop.f32.mrf.mxu1 }
 0x2c1   : > { %3217 = vst [vmem:[%s4752_s13 + $0xf8] sm:$0xff] %v3174_v5  ;;  %v3178_v12 = vadd.f32 %v3177_v7, %v3055_v39  ;;  %v3057_v6 = vadd.f32 %v3056_v55, %v4741_v46 }
 0x2c2   : > { %v3058_v48 = vpop.f32.mrf.mxu0  ;;  %v3181_v63 = vpop.f32.mrf.mxu1 }
 0x2c3   : > { %3218 = vst [vmem:[%s4752_s13 + $0x100] sm:$0xff] %v3178_v12  ;;  %v3180_v24 = vadd.f32 %v3179_v47, %v3057_v6  ;;  %v3059_v60 = vadd.f32 %v3058_v48, %v4745_v18 }
 0x2c4   : > { %v3060_v29 = vpop.f32.mrf.mxu0  ;;  %v3183_v22 = vpop.f32.mrf.mxu1 }
 0x2c5   : > { %3219 = vst [vmem:[%s4752_s13 + $0x108] sm:$0xff] %v3180_v24  ;;  %v3182_v8 = vadd.f32 %v3181_v63, %v3059_v60  ;;  %v3061_v54 = vadd.f32 %v3060_v29, %v4748_v53 }
 0x2c7   : > { %3220 = vst [vmem:[%s4752_s13 + $0x110] sm:$0xff] %v3182_v8  ;;  %v3184_v46 = vadd.f32 %v3183_v22, %v3061_v54 }
 0x2c9   : > { %3221 = vst [vmem:[%s4752_s13 + $0x118] sm:$0xff] %v3184_v46 }
 0x2ca   : > { %4059 = shalt.err (!%p4056_p9)
}
 0x2cb   : > { %s4060_s12 = scalar_lea.hbm %s4827_s8, 4608  ;;  %s4064_s26 = scalar_lea.hbm %s4879_s5, 9216 }
 0x2cc   : > { %p4061_p1 = scmp.ne.s32.totalorder %s4827_s8, %s4060_s12  ;;  %p4065_p11 = scmp.lt.s32.totalorder %s4827_s8, %s4879_s5 }
 0x2cd   : > { %p4066_p13 = scmp.lt.s32.totalorder %s4064_s26, %s4060_s12 }
 0x2ce   : > { %p4062_p8 = pnand %p4061_p1, %p4899_p6 }
 0x2cf   : > { %p4067_p2 = por %p4066_p13, %p4065_p11 }
 0x2d0   : > { %p4063_p10 = pneg %p4062_p8 }
 0x2d2   : > { %p4068_p4 = pnand %p4067_p2, %p4063_p10 }
 0x2d4   : > { %4071 = shalt.err (!%p4068_p4)
}
 0x2d5   : > { %s4129_s16 = smov 256   ;;  %s4130_s30 = smov 16  }
 0x2d6   : > { %3652 = dma.vmem_to_hbm [thread:$0]  (%p4899_p6), %s4829_s28, 4608, %s4827_s8, %s3223_s22, %s4129_s16, %s4129_s16, %s4130_s30  }
 0x2d7 PF: > { %s3252_s11 = sand.u32 1, %s4106_s18   ;;  %p4900_p12 = scmp.ne.s32.totalorder %s4886_s25, 0 }
 0x2d8   : > { %p4901_p0 = scmp.ge.s32.totalorder %s4118_s21, 2  ;;  %s3253_s17 = scalar_lea.sflag [#allocation4], %s3252_s11 }
 0x2da   : > { %p3669_p5 = pnand %p4901_p0, %p4900_p12 }
 0x2dc   : > { %p3670_p3 = pneg %p3669_p5 }
 0x2de   : > { %4101 = dma.done.wait (%p3670_p3), %s3253_s17, 4608  }
 0x2df   : > { %4103 = vsyncadd (%p3670_p3), %s3253_s17, 4294962688  ;;  %p20_p7 = scmp.ge.s32.totalorder %s4244_s6, 4   ;;  %s4902_s18 = smov %s4110_s19 }
 0x2e0   : > { %s4903_s19 = smov %s4114_s20  ;;  %s4904_s20 = smov %s4254_s10 }
 0x2e1   : > { %s4905_s21 = smov %s4244_s6  ;;  %22 = sbr.rel (!%p20_p7) target bundleno = 7 (0x7), region = 97 }
 0x2e6   :  { %3258 = vsyncpa [#allocation3], 1 }
 0x2e7   :  { %3260 = vsyncpa [#allocation3 + $0x1], 1 }
 0x2e8   :  { %3261 = vsyncpa [#allocation6], 1 }
 0x2e9   :  { %3262 = vsyncpa [#allocation9], 1 }
 0x2ea   :  { %3263 = vsyncpa [#allocation4], 1 }
 0x2eb   :  { %3265 = vsyncpa [#allocation4 + $0x1], 1 }

</bundles_post_ra>
